<compile_context>
chip_gen: v5e
topology: v5e:2x2
jax: 0.10.0
libtpu: 0.0.40
codegen_flags: <defaults>
</compile_context>

<pallas_src>
import functools

import jax
import jax.numpy as jnp
from jax import lax
from jax.experimental import pallas as pl
from jax.experimental.pallas import tpu as pltpu


# ----------------------------------------------------------------------------
# Fused Pallas kernel: all LSTM layers + FC head
# ----------------------------------------------------------------------------
def _fused_lstm_kernel(*args, hidden_size, num_layers, seq_len, batch):
    """args = (x_ref, [wih_l, whh_l, b_l]*num_layers, fcw_ref, fcb_ref,
               out_ref, hseq_scr)

    x_ref    : (T*B, Din)  time-major input, flattened so each timestep is an
                           8-row (sublane-aligned) block
    wih_l    : (Din_l, 4H) W_ih^T, gate order [i, f, g, o] (PyTorch order)
    whh_l    : (H,    4H)  W_hh^T
    b_l      : (1,    4H)  b_ih + b_hh
    fcw_ref  : (H, 2)      FC weight transposed
    fcb_ref  : (1, 2)      FC bias
    out_ref  : (B, 2)      output
    hseq_scr : (T*B, H)    VMEM scratch: layer-l hidden sequence handed to l+1
    """
    H, T, B = hidden_size, seq_len, batch
    x_ref = args[0]
    layer_refs = args[1:1 + 3 * num_layers]
    fcw_ref = args[1 + 3 * num_layers]
    fcb_ref = args[2 + 3 * num_layers]
    out_ref = args[3 + 3 * num_layers]
    hseq_scr = args[4 + 3 * num_layers]

    layer_in = x_ref[...]                              # (T*B, Din)
    h = None
    for l in range(num_layers):                        # static (few layers)
        wih = layer_refs[3 * l][...]                   # (Din_l, 4H)
        whh = layer_refs[3 * l + 1][...]               # (H, 4H)
        b = layer_refs[3 * l + 2][...]                 # (1, 4H)

        # Hoisted input projection for every timestep at once (one MXU issue
        # instead of T tiny ones).
        gates_x = jnp.dot(layer_in, wih,
                          preferred_element_type=jnp.float32) + b  # (T*B, 4H)

        h = jnp.zeros((B, H), jnp.float32)
        c = jnp.zeros((B, H), jnp.float32)
        last_layer = (l + 1 == num_layers)

        for t in range(T):                             # static unroll (T small)
            gates = gates_x[t * B:(t + 1) * B, :] + jnp.dot(
                h, whh, preferred_element_type=jnp.float32)        # (B, 4H)
            sg = jax.nn.sigmoid(gates)                 # full-width: 1 EUP push
            th = jnp.tanh(gates)                       # full-width: 1 EUP push
            i_g = sg[:, 0 * H:1 * H]
            f_g = sg[:, 1 * H:2 * H]
            g_g = th[:, 2 * H:3 * H]
            o_g = sg[:, 3 * H:4 * H]
            c = f_g * c + i_g * g_g
            h = o_g * jnp.tanh(c)
            if not last_layer:
                hseq_scr[t * B:(t + 1) * B, :] = h     # sublane-aligned store

        if not last_layer:
            layer_in = hseq_scr[...]                   # (T*B, H) for next layer

    # Fused FC head on the final layer's last hidden state.
    out_ref[...] = (jnp.dot(h, fcw_ref[...],
                            preferred_element_type=jnp.float32) + fcb_ref[...])


# ----------------------------------------------------------------------------
# Wrapper
# ----------------------------------------------------------------------------
def lstm_model_forward(x, flat_params):
    """x: (B, T, input_size) batch_first — same as the PyTorch module.

    flat_params: tuple produced by preprocess_params(params):
      (wih0_t, whh0_t, b0, ..., wih{L-1}_t, whh{L-1}_t, b{L-1}, fc_w_t, fc_b)
    Returns (B, 2).
    """
    B, T, Din = x.shape
    num_layers = (len(flat_params) - 2) // 3
    H = flat_params[1].shape[0]                       # whh_t: (H, 4H)

    # Pad batch to a sublane multiple of 8 so per-timestep slices are aligned.
    B_pad = ((B + 7) // 8) * 8
    x_p = jnp.pad(x, ((0, B_pad - B), (0, 0), (0, 0)))
    # Time-major, flattened to 2-D: row index = t * B_pad + b.
    x_2d = jnp.transpose(x_p, (1, 0, 2)).reshape(T * B_pad, Din)

    vmem = pl.BlockSpec(memory_space=pltpu.MemorySpace.VMEM)
    kernel = functools.partial(_fused_lstm_kernel, hidden_size=H,
                               num_layers=num_layers, seq_len=T, batch=B_pad)
    out_pad = pl.pallas_call(
        kernel,
        out_shape=jax.ShapeDtypeStruct((B_pad, 2), jnp.float32),
        in_specs=[vmem] * (1 + len(flat_params)),
        out_specs=vmem,
        scratch_shapes=[pltpu.VMEM((T * B_pad, H), jnp.float32)],
    )(x_2d, *flat_params)
    return out_pad[:B]


# ----------------------------------------------------------------------------
# One-time parameter preprocessing (transpose + combine biases)
# ----------------------------------------------------------------------------
def preprocess_params(params):
    flat = []
    for (w_ih, w_hh, b_ih, b_hh) in params["lstm"]:
        flat.append(jnp.transpose(w_ih))                     # (Din, 4H)
        flat.append(jnp.transpose(w_hh))                     # (H, 4H)
        flat.append((b_ih + b_hh).reshape(1, -1))            # (1, 4H)
    flat.append(jnp.transpose(params["fc_w"]))               # (H, 2)
    flat.append(params["fc_b"].reshape(1, 2))                # (1, 2)
    return tuple(flat)


# ----------------------------------------------------------------------------
# Deterministic parameter construction (PyTorch-style U(-1/sqrt(H), 1/sqrt(H)))
# ----------------------------------------------------------------------------
def init_params(key, input_size, hidden_size, num_layers):
    bound = 1.0 / jnp.sqrt(hidden_size)
    params = {"lstm": []}
    for layer in range(num_layers):
        din = input_size if layer == 0 else hidden_size
        key, k1, k2, k3, k4 = jax.random.split(key, 5)
        w_ih = jax.random.uniform(k1, (4 * hidden_size, din),
                                  minval=-bound, maxval=bound, dtype=jnp.float32)
        w_hh = jax.random.uniform(k2, (4 * hidden_size, hidden_size),
                                  minval=-bound, maxval=bound, dtype=jnp.float32)
        b_ih = jax.random.uniform(k3, (4 * hidden_size,),
                                  minval=-bound, maxval=bound, dtype=jnp.float32)
        b_hh = jax.random.uniform(k4, (4 * hidden_size,),
                                  minval=-bound, maxval=bound, dtype=jnp.float32)
        params["lstm"].append((w_ih, w_hh, b_ih, b_hh))
    key, k5, k6 = jax.random.split(key, 3)
    params["fc_w"] = jax.random.uniform(k5, (2, hidden_size),
                                        minval=-bound, maxval=bound,
                                        dtype=jnp.float32)
    params["fc_b"] = jax.random.uniform(k6, (2,),
                                        minval=-bound, maxval=bound,
                                        dtype=jnp.float32)
    return params


# ----------------------------------------------------------------------------
# Pure-JAX reference (mirrors torch.nn.LSTM semantics) for a sanity check
# ----------------------------------------------------------------------------
def reference_forward(x, params):
    B, T, _ = x.shape
    layer_in = x
    h_last = None
    for (w_ih, w_hh, b_ih, b_hh) in params["lstm"]:
        H = w_hh.shape[1]
        h = jnp.zeros((B, H), jnp.float32)
        c = jnp.zeros((B, H), jnp.float32)

        def step(carry, x_t):
            h, c = carry
            gates = x_t @ w_ih.T + h @ w_hh.T + b_ih + b_hh
            i = jax.nn.sigmoid(gates[:, 0 * H:1 * H])
            f = jax.nn.sigmoid(gates[:, 1 * H:2 * H])
            g = jnp.tanh(gates[:, 2 * H:3 * H])
            o = jax.nn.sigmoid(gates[:, 3 * H:4 * H])
            c = f * c + i * g
            h = o * jnp.tanh(c)
            return (h, c), h

        (h, c), hs = lax.scan(step, (h, c), jnp.transpose(layer_in, (1, 0, 2)))
        h_last = h
        layer_in = jnp.transpose(hs, (1, 0, 2))
    return h_last @ params["fc_w"].T + params["fc_b"]


# ----------------------------------------------------------------------------
if __name__ == "__main__":
    B, T = 2, 8
    INPUT_SIZE, HIDDEN_SIZE, NUM_LAYERS = 16, 32, 2

    key = jax.random.PRNGKey(0)
    key, kx = jax.random.split(key)
    x = jax.random.normal(kx, (B, T, INPUT_SIZE), dtype=jnp.float32)
    params = init_params(key, INPUT_SIZE, HIDDEN_SIZE, NUM_LAYERS)
    flat_params = preprocess_params(params)          # one-time preprocessing

    fwd = jax.jit(lstm_model_forward)
    out = jax.block_until_ready(fwd(x, flat_params))

    ref = jax.block_until_ready(reference_forward(x, params))
    assert out.shape == (B, 2)
    assert jnp.allclose(out, ref, atol=1e-5, rtol=1e-5), (out, ref)

    print("KERNEL_OK")
</pallas_src>

<mosaic_0001>
module attributes {stable_mosaic.version = 11 : i64} {
  func.func @_fused_lstm_kernel(%arg0: memref<64x16xf32, #tpu.memory_space<vmem>>, %arg1: memref<16x128xf32, #tpu.memory_space<vmem>>, %arg2: memref<32x128xf32, #tpu.memory_space<vmem>>, %arg3: memref<1x128xf32, #tpu.memory_space<vmem>>, %arg4: memref<32x128xf32, #tpu.memory_space<vmem>>, %arg5: memref<32x128xf32, #tpu.memory_space<vmem>>, %arg6: memref<1x128xf32, #tpu.memory_space<vmem>>, %arg7: memref<32x2xf32, #tpu.memory_space<vmem>>, %arg8: memref<1x2xf32, #tpu.memory_space<vmem>>, %arg9: memref<8x2xf32, #tpu.memory_space<vmem>>, %arg10: memref<64x32xf32, #tpu.memory_space<vmem>>) attributes {dimension_semantics = [], scalar_prefetch = 0 : i64, scratch_operands = 1 : i64, tpu.core_type = #tpu.core_type<tc>} {
    %c0 = arith.constant 0 : index
    %c0_0 = arith.constant 0 : index
    %0 = vector.load %arg0[%c0, %c0_0] : memref<64x16xf32, #tpu.memory_space<vmem>>, vector<64x16xf32>
    %c0_1 = arith.constant 0 : index
    %c0_2 = arith.constant 0 : index
    %1 = vector.load %arg1[%c0_1, %c0_2] : memref<16x128xf32, #tpu.memory_space<vmem>>, vector<16x128xf32>
    %c0_3 = arith.constant 0 : index
    %c0_4 = arith.constant 0 : index
    %2 = vector.load %arg2[%c0_3, %c0_4] : memref<32x128xf32, #tpu.memory_space<vmem>>, vector<32x128xf32>
    %c0_5 = arith.constant 0 : index
    %c0_6 = arith.constant 0 : index
    %3 = vector.load %arg3[%c0_5, %c0_6] : memref<1x128xf32, #tpu.memory_space<vmem>>, vector<1x128xf32>
    %cst = arith.constant dense<0.000000e+00> : vector<64x128xf32>
    %4 = tpu.matmul %0, %1, %cst {dimension_numbers = #tpu.dot_dimension_numbers<[1], [0], [0], [1], [0, 0, 1, 1], [], []>} : vector<64x16xf32>, vector<16x128xf32>, vector<64x128xf32> -> vector<64x128xf32>
    %5 = vector.broadcast %3 : vector<1x128xf32> to vector<64x128xf32>
    %6 = arith.addf %4, %5 : vector<64x128xf32>
    %cst_7 = arith.constant 0.000000e+00 : f32
    %7 = vector.broadcast %cst_7 : f32 to vector<8x32xf32>
    %cst_8 = arith.constant 0.000000e+00 : f32
    %8 = vector.broadcast %cst_8 : f32 to vector<8x32xf32>
    %9 = vector.extract_strided_slice %6 {offsets = [0, 0], sizes = [8, 128], strides = [1, 1]} : vector<64x128xf32> to vector<8x128xf32>
    %cst_9 = arith.constant dense<0.000000e+00> : vector<8x128xf32>
    %10 = tpu.matmul %7, %2, %cst_9 {dimension_numbers = #tpu.dot_dimension_numbers<[1], [0], [0], [1], [0, 0, 1, 1], [], []>} : vector<8x32xf32>, vector<32x128xf32>, vector<8x128xf32> -> vector<8x128xf32>
    %11 = arith.addf %9, %10 : vector<8x128xf32>
    %12 = arith.negf %11 : vector<8x128xf32>
    %13 = math.exp %12 : vector<8x128xf32>
    %cst_10 = arith.constant 1.000000e+00 : f32
    %14 = vector.broadcast %cst_10 : f32 to vector<8x128xf32>
    %15 = arith.addf %14, %13 : vector<8x128xf32>
    %16 = arith.divf %14, %15 : vector<8x128xf32>
    %17 = math.tanh %11 : vector<8x128xf32>
    %18 = vector.extract_strided_slice %16 {offsets = [0, 0], sizes = [8, 32], strides = [1, 1]} : vector<8x128xf32> to vector<8x32xf32>
    %19 = vector.extract_strided_slice %16 {offsets = [0, 32], sizes = [8, 32], strides = [1, 1]} : vector<8x128xf32> to vector<8x32xf32>
    %20 = vector.extract_strided_slice %17 {offsets = [0, 64], sizes = [8, 32], strides = [1, 1]} : vector<8x128xf32> to vector<8x32xf32>
    %21 = vector.extract_strided_slice %16 {offsets = [0, 96], sizes = [8, 32], strides = [1, 1]} : vector<8x128xf32> to vector<8x32xf32>
    %22 = arith.mulf %19, %8 : vector<8x32xf32>
    %23 = arith.mulf %18, %20 : vector<8x32xf32>
    %24 = arith.addf %22, %23 : vector<8x32xf32>
    %25 = math.tanh %24 : vector<8x32xf32>
    %26 = arith.mulf %21, %25 : vector<8x32xf32>
    %c0_11 = arith.constant 0 : index
    %c0_12 = arith.constant 0 : index
    %27 = vector.load %arg10[%c0_11, %c0_12] : memref<64x32xf32, #tpu.memory_space<vmem>>, vector<8x32xf32>
    tpu.vector_store %arg10[%c0_11, %c0_12], %26 {strides = array<i32>} : memref<64x32xf32, #tpu.memory_space<vmem>>, vector<8x32xf32>,
    %28 = vector.extract_strided_slice %6 {offsets = [8, 0], sizes = [8, 128], strides = [1, 1]} : vector<64x128xf32> to vector<8x128xf32>
    %cst_13 = arith.constant dense<0.000000e+00> : vector<8x128xf32>
    %29 = tpu.matmul %26, %2, %cst_13 {dimension_numbers = #tpu.dot_dimension_numbers<[1], [0], [0], [1], [0, 0, 1, 1], [], []>} : vector<8x32xf32>, vector<32x128xf32>, vector<8x128xf32> -> vector<8x128xf32>
    %30 = arith.addf %28, %29 : vector<8x128xf32>
    %31 = arith.negf %30 : vector<8x128xf32>
    %32 = math.exp %31 : vector<8x128xf32>
    %cst_14 = arith.constant 1.000000e+00 : f32
    %33 = vector.broadcast %cst_14 : f32 to vector<8x128xf32>
    %34 = arith.addf %33, %32 : vector<8x128xf32>
    %35 = arith.divf %33, %34 : vector<8x128xf32>
    %36 = math.tanh %30 : vector<8x128xf32>
    %37 = vector.extract_strided_slice %35 {offsets = [0, 0], sizes = [8, 32], strides = [1, 1]} : vector<8x128xf32> to vector<8x32xf32>
    %38 = vector.extract_strided_slice %35 {offsets = [0, 32], sizes = [8, 32], strides = [1, 1]} : vector<8x128xf32> to vector<8x32xf32>
    %39 = vector.extract_strided_slice %36 {offsets = [0, 64], sizes = [8, 32], strides = [1, 1]} : vector<8x128xf32> to vector<8x32xf32>
    %40 = vector.extract_strided_slice %35 {offsets = [0, 96], sizes = [8, 32], strides = [1, 1]} : vector<8x128xf32> to vector<8x32xf32>
    %41 = arith.mulf %38, %24 : vector<8x32xf32>
    %42 = arith.mulf %37, %39 : vector<8x32xf32>
    %43 = arith.addf %41, %42 : vector<8x32xf32>
    %44 = math.tanh %43 : vector<8x32xf32>
    %45 = arith.mulf %40, %44 : vector<8x32xf32>
    %c8 = arith.constant 8 : index
    %c0_15 = arith.constant 0 : index
    %46 = vector.load %arg10[%c8, %c0_15] : memref<64x32xf32, #tpu.memory_space<vmem>>, vector<8x32xf32>
    tpu.vector_store %arg10[%c8, %c0_15], %45 {strides = array<i32>} : memref<64x32xf32, #tpu.memory_space<vmem>>, vector<8x32xf32>,
    %47 = vector.extract_strided_slice %6 {offsets = [16, 0], sizes = [8, 128], strides = [1, 1]} : vector<64x128xf32> to vector<8x128xf32>
    %cst_16 = arith.constant dense<0.000000e+00> : vector<8x128xf32>
    %48 = tpu.matmul %45, %2, %cst_16 {dimension_numbers = #tpu.dot_dimension_numbers<[1], [0], [0], [1], [0, 0, 1, 1], [], []>} : vector<8x32xf32>, vector<32x128xf32>, vector<8x128xf32> -> vector<8x128xf32>
    %49 = arith.addf %47, %48 : vector<8x128xf32>
    %50 = arith.negf %49 : vector<8x128xf32>
    %51 = math.exp %50 : vector<8x128xf32>
    %cst_17 = arith.constant 1.000000e+00 : f32
    %52 = vector.broadcast %cst_17 : f32 to vector<8x128xf32>
    %53 = arith.addf %52, %51 : vector<8x128xf32>
    %54 = arith.divf %52, %53 : vector<8x128xf32>
    %55 = math.tanh %49 : vector<8x128xf32>
    %56 = vector.extract_strided_slice %54 {offsets = [0, 0], sizes = [8, 32], strides = [1, 1]} : vector<8x128xf32> to vector<8x32xf32>
    %57 = vector.extract_strided_slice %54 {offsets = [0, 32], sizes = [8, 32], strides = [1, 1]} : vector<8x128xf32> to vector<8x32xf32>
    %58 = vector.extract_strided_slice %55 {offsets = [0, 64], sizes = [8, 32], strides = [1, 1]} : vector<8x128xf32> to vector<8x32xf32>
    %59 = vector.extract_strided_slice %54 {offsets = [0, 96], sizes = [8, 32], strides = [1, 1]} : vector<8x128xf32> to vector<8x32xf32>
    %60 = arith.mulf %57, %43 : vector<8x32xf32>
    %61 = arith.mulf %56, %58 : vector<8x32xf32>
    %62 = arith.addf %60, %61 : vector<8x32xf32>
    %63 = math.tanh %62 : vector<8x32xf32>
    %64 = arith.mulf %59, %63 : vector<8x32xf32>
    %c16 = arith.constant 16 : index
    %c0_18 = arith.constant 0 : index
    %65 = vector.load %arg10[%c16, %c0_18] : memref<64x32xf32, #tpu.memory_space<vmem>>, vector<8x32xf32>
    tpu.vector_store %arg10[%c16, %c0_18], %64 {strides = array<i32>} : memref<64x32xf32, #tpu.memory_space<vmem>>, vector<8x32xf32>,
    %66 = vector.extract_strided_slice %6 {offsets = [24, 0], sizes = [8, 128], strides = [1, 1]} : vector<64x128xf32> to vector<8x128xf32>
    %cst_19 = arith.constant dense<0.000000e+00> : vector<8x128xf32>
    %67 = tpu.matmul %64, %2, %cst_19 {dimension_numbers = #tpu.dot_dimension_numbers<[1], [0], [0], [1], [0, 0, 1, 1], [], []>} : vector<8x32xf32>, vector<32x128xf32>, vector<8x128xf32> -> vector<8x128xf32>
    %68 = arith.addf %66, %67 : vector<8x128xf32>
    %69 = arith.negf %68 : vector<8x128xf32>
    %70 = math.exp %69 : vector<8x128xf32>
    %cst_20 = arith.constant 1.000000e+00 : f32
    %71 = vector.broadcast %cst_20 : f32 to vector<8x128xf32>
    %72 = arith.addf %71, %70 : vector<8x128xf32>
    %73 = arith.divf %71, %72 : vector<8x128xf32>
    %74 = math.tanh %68 : vector<8x128xf32>
    %75 = vector.extract_strided_slice %73 {offsets = [0, 0], sizes = [8, 32], strides = [1, 1]} : vector<8x128xf32> to vector<8x32xf32>
    %76 = vector.extract_strided_slice %73 {offsets = [0, 32], sizes = [8, 32], strides = [1, 1]} : vector<8x128xf32> to vector<8x32xf32>
    %77 = vector.extract_strided_slice %74 {offsets = [0, 64], sizes = [8, 32], strides = [1, 1]} : vector<8x128xf32> to vector<8x32xf32>
    %78 = vector.extract_strided_slice %73 {offsets = [0, 96], sizes = [8, 32], strides = [1, 1]} : vector<8x128xf32> to vector<8x32xf32>
    %79 = arith.mulf %76, %62 : vector<8x32xf32>
    %80 = arith.mulf %75, %77 : vector<8x32xf32>
    %81 = arith.addf %79, %80 : vector<8x32xf32>
    %82 = math.tanh %81 : vector<8x32xf32>
    %83 = arith.mulf %78, %82 : vector<8x32xf32>
    %c24 = arith.constant 24 : index
    %c0_21 = arith.constant 0 : index
    %84 = vector.load %arg10[%c24, %c0_21] : memref<64x32xf32, #tpu.memory_space<vmem>>, vector<8x32xf32>
    tpu.vector_store %arg10[%c24, %c0_21], %83 {strides = array<i32>} : memref<64x32xf32, #tpu.memory_space<vmem>>, vector<8x32xf32>,
    %85 = vector.extract_strided_slice %6 {offsets = [32, 0], sizes = [8, 128], strides = [1, 1]} : vector<64x128xf32> to vector<8x128xf32>
    %cst_22 = arith.constant dense<0.000000e+00> : vector<8x128xf32>
    %86 = tpu.matmul %83, %2, %cst_22 {dimension_numbers = #tpu.dot_dimension_numbers<[1], [0], [0], [1], [0, 0, 1, 1], [], []>} : vector<8x32xf32>, vector<32x128xf32>, vector<8x128xf32> -> vector<8x128xf32>
    %87 = arith.addf %85, %86 : vector<8x128xf32>
    %88 = arith.negf %87 : vector<8x128xf32>
    %89 = math.exp %88 : vector<8x128xf32>
    %cst_23 = arith.constant 1.000000e+00 : f32
    %90 = vector.broadcast %cst_23 : f32 to vector<8x128xf32>
    %91 = arith.addf %90, %89 : vector<8x128xf32>
    %92 = arith.divf %90, %91 : vector<8x128xf32>
    %93 = math.tanh %87 : vector<8x128xf32>
    %94 = vector.extract_strided_slice %92 {offsets = [0, 0], sizes = [8, 32], strides = [1, 1]} : vector<8x128xf32> to vector<8x32xf32>
    %95 = vector.extract_strided_slice %92 {offsets = [0, 32], sizes = [8, 32], strides = [1, 1]} : vector<8x128xf32> to vector<8x32xf32>
    %96 = vector.extract_strided_slice %93 {offsets = [0, 64], sizes = [8, 32], strides = [1, 1]} : vector<8x128xf32> to vector<8x32xf32>
    %97 = vector.extract_strided_slice %92 {offsets = [0, 96], sizes = [8, 32], strides = [1, 1]} : vector<8x128xf32> to vector<8x32xf32>
    %98 = arith.mulf %95, %81 : vector<8x32xf32>
    %99 = arith.mulf %94, %96 : vector<8x32xf32>
    %100 = arith.addf %98, %99 : vector<8x32xf32>
    %101 = math.tanh %100 : vector<8x32xf32>
    %102 = arith.mulf %97, %101 : vector<8x32xf32>
    %c32 = arith.constant 32 : index
    %c0_24 = arith.constant 0 : index
    %103 = vector.load %arg10[%c32, %c0_24] : memref<64x32xf32, #tpu.memory_space<vmem>>, vector<8x32xf32>
    tpu.vector_store %arg10[%c32, %c0_24], %102 {strides = array<i32>} : memref<64x32xf32, #tpu.memory_space<vmem>>, vector<8x32xf32>,
    %104 = vector.extract_strided_slice %6 {offsets = [40, 0], sizes = [8, 128], strides = [1, 1]} : vector<64x128xf32> to vector<8x128xf32>
    %cst_25 = arith.constant dense<0.000000e+00> : vector<8x128xf32>
    %105 = tpu.matmul %102, %2, %cst_25 {dimension_numbers = #tpu.dot_dimension_numbers<[1], [0], [0], [1], [0, 0, 1, 1], [], []>} : vector<8x32xf32>, vector<32x128xf32>, vector<8x128xf32> -> vector<8x128xf32>
    %106 = arith.addf %104, %105 : vector<8x128xf32>
    %107 = arith.negf %106 : vector<8x128xf32>
    %108 = math.exp %107 : vector<8x128xf32>
    %cst_26 = arith.constant 1.000000e+00 : f32
    %109 = vector.broadcast %cst_26 : f32 to vector<8x128xf32>
    %110 = arith.addf %109, %108 : vector<8x128xf32>
    %111 = arith.divf %109, %110 : vector<8x128xf32>
    %112 = math.tanh %106 : vector<8x128xf32>
    %113 = vector.extract_strided_slice %111 {offsets = [0, 0], sizes = [8, 32], strides = [1, 1]} : vector<8x128xf32> to vector<8x32xf32>
    %114 = vector.extract_strided_slice %111 {offsets = [0, 32], sizes = [8, 32], strides = [1, 1]} : vector<8x128xf32> to vector<8x32xf32>
    %115 = vector.extract_strided_slice %112 {offsets = [0, 64], sizes = [8, 32], strides = [1, 1]} : vector<8x128xf32> to vector<8x32xf32>
    %116 = vector.extract_strided_slice %111 {offsets = [0, 96], sizes = [8, 32], strides = [1, 1]} : vector<8x128xf32> to vector<8x32xf32>
    %117 = arith.mulf %114, %100 : vector<8x32xf32>
    %118 = arith.mulf %113, %115 : vector<8x32xf32>
    %119 = arith.addf %117, %118 : vector<8x32xf32>
    %120 = math.tanh %119 : vector<8x32xf32>
    %121 = arith.mulf %116, %120 : vector<8x32xf32>
    %c40 = arith.constant 40 : index
    %c0_27 = arith.constant 0 : index
    %122 = vector.load %arg10[%c40, %c0_27] : memref<64x32xf32, #tpu.memory_space<vmem>>, vector<8x32xf32>
    tpu.vector_store %arg10[%c40, %c0_27], %121 {strides = array<i32>} : memref<64x32xf32, #tpu.memory_space<vmem>>, vector<8x32xf32>,
    %123 = vector.extract_strided_slice %6 {offsets = [48, 0], sizes = [8, 128], strides = [1, 1]} : vector<64x128xf32> to vector<8x128xf32>
    %cst_28 = arith.constant dense<0.000000e+00> : vector<8x128xf32>
    %124 = tpu.matmul %121, %2, %cst_28 {dimension_numbers = #tpu.dot_dimension_numbers<[1], [0], [0], [1], [0, 0, 1, 1], [], []>} : vector<8x32xf32>, vector<32x128xf32>, vector<8x128xf32> -> vector<8x128xf32>
    %125 = arith.addf %123, %124 : vector<8x128xf32>
    %126 = arith.negf %125 : vector<8x128xf32>
    %127 = math.exp %126 : vector<8x128xf32>
    %cst_29 = arith.constant 1.000000e+00 : f32
    %128 = vector.broadcast %cst_29 : f32 to vector<8x128xf32>
    %129 = arith.addf %128, %127 : vector<8x128xf32>
    %130 = arith.divf %128, %129 : vector<8x128xf32>
    %131 = math.tanh %125 : vector<8x128xf32>
    %132 = vector.extract_strided_slice %130 {offsets = [0, 0], sizes = [8, 32], strides = [1, 1]} : vector<8x128xf32> to vector<8x32xf32>
    %133 = vector.extract_strided_slice %130 {offsets = [0, 32], sizes = [8, 32], strides = [1, 1]} : vector<8x128xf32> to vector<8x32xf32>
    %134 = vector.extract_strided_slice %131 {offsets = [0, 64], sizes = [8, 32], strides = [1, 1]} : vector<8x128xf32> to vector<8x32xf32>
    %135 = vector.extract_strided_slice %130 {offsets = [0, 96], sizes = [8, 32], strides = [1, 1]} : vector<8x128xf32> to vector<8x32xf32>
    %136 = arith.mulf %133, %119 : vector<8x32xf32>
    %137 = arith.mulf %132, %134 : vector<8x32xf32>
    %138 = arith.addf %136, %137 : vector<8x32xf32>
    %139 = math.tanh %138 : vector<8x32xf32>
    %140 = arith.mulf %135, %139 : vector<8x32xf32>
    %c48 = arith.constant 48 : index
    %c0_30 = arith.constant 0 : index
    %141 = vector.load %arg10[%c48, %c0_30] : memref<64x32xf32, #tpu.memory_space<vmem>>, vector<8x32xf32>
    tpu.vector_store %arg10[%c48, %c0_30], %140 {strides = array<i32>} : memref<64x32xf32, #tpu.memory_space<vmem>>, vector<8x32xf32>,
    %142 = vector.extract_strided_slice %6 {offsets = [56, 0], sizes = [8, 128], strides = [1, 1]} : vector<64x128xf32> to vector<8x128xf32>
    %cst_31 = arith.constant dense<0.000000e+00> : vector<8x128xf32>
    %143 = tpu.matmul %140, %2, %cst_31 {dimension_numbers = #tpu.dot_dimension_numbers<[1], [0], [0], [1], [0, 0, 1, 1], [], []>} : vector<8x32xf32>, vector<32x128xf32>, vector<8x128xf32> -> vector<8x128xf32>
    %144 = arith.addf %142, %143 : vector<8x128xf32>
    %145 = arith.negf %144 : vector<8x128xf32>
    %146 = math.exp %145 : vector<8x128xf32>
    %cst_32 = arith.constant 1.000000e+00 : f32
    %147 = vector.broadcast %cst_32 : f32 to vector<8x128xf32>
    %148 = arith.addf %147, %146 : vector<8x128xf32>
    %149 = arith.divf %147, %148 : vector<8x128xf32>
    %150 = math.tanh %144 : vector<8x128xf32>
    %151 = vector.extract_strided_slice %149 {offsets = [0, 0], sizes = [8, 32], strides = [1, 1]} : vector<8x128xf32> to vector<8x32xf32>
    %152 = vector.extract_strided_slice %149 {offsets = [0, 32], sizes = [8, 32], strides = [1, 1]} : vector<8x128xf32> to vector<8x32xf32>
    %153 = vector.extract_strided_slice %150 {offsets = [0, 64], sizes = [8, 32], strides = [1, 1]} : vector<8x128xf32> to vector<8x32xf32>
    %154 = vector.extract_strided_slice %149 {offsets = [0, 96], sizes = [8, 32], strides = [1, 1]} : vector<8x128xf32> to vector<8x32xf32>
    %155 = arith.mulf %152, %138 : vector<8x32xf32>
    %156 = arith.mulf %151, %153 : vector<8x32xf32>
    %157 = arith.addf %155, %156 : vector<8x32xf32>
    %158 = math.tanh %157 : vector<8x32xf32>
    %159 = arith.mulf %154, %158 : vector<8x32xf32>
    %c56 = arith.constant 56 : index
    %c0_33 = arith.constant 0 : index
    %160 = vector.load %arg10[%c56, %c0_33] : memref<64x32xf32, #tpu.memory_space<vmem>>, vector<8x32xf32>
    tpu.vector_store %arg10[%c56, %c0_33], %159 {strides = array<i32>} : memref<64x32xf32, #tpu.memory_space<vmem>>, vector<8x32xf32>,
    %c0_34 = arith.constant 0 : index
    %c0_35 = arith.constant 0 : index
    %161 = vector.load %arg10[%c0_34, %c0_35] : memref<64x32xf32, #tpu.memory_space<vmem>>, vector<64x32xf32>
    %c0_36 = arith.constant 0 : index
    %c0_37 = arith.constant 0 : index
    %162 = vector.load %arg4[%c0_36, %c0_37] : memref<32x128xf32, #tpu.memory_space<vmem>>, vector<32x128xf32>
    %c0_38 = arith.constant 0 : index
    %c0_39 = arith.constant 0 : index
    %163 = vector.load %arg5[%c0_38, %c0_39] : memref<32x128xf32, #tpu.memory_space<vmem>>, vector<32x128xf32>
    %c0_40 = arith.constant 0 : index
    %c0_41 = arith.constant 0 : index
    %164 = vector.load %arg6[%c0_40, %c0_41] : memref<1x128xf32, #tpu.memory_space<vmem>>, vector<1x128xf32>
    %cst_42 = arith.constant dense<0.000000e+00> : vector<64x128xf32>
    %165 = tpu.matmul %161, %162, %cst_42 {dimension_numbers = #tpu.dot_dimension_numbers<[1], [0], [0], [1], [0, 0, 1, 1], [], []>} : vector<64x32xf32>, vector<32x128xf32>, vector<64x128xf32> -> vector<64x128xf32>
    %166 = vector.broadcast %164 : vector<1x128xf32> to vector<64x128xf32>
    %167 = arith.addf %165, %166 : vector<64x128xf32>
    %cst_43 = arith.constant 0.000000e+00 : f32
    %168 = vector.broadcast %cst_43 : f32 to vector<8x32xf32>
    %cst_44 = arith.constant 0.000000e+00 : f32
    %169 = vector.broadcast %cst_44 : f32 to vector<8x32xf32>
    %170 = vector.extract_strided_slice %167 {offsets = [0, 0], sizes = [8, 128], strides = [1, 1]} : vector<64x128xf32> to vector<8x128xf32>
    %cst_45 = arith.constant dense<0.000000e+00> : vector<8x128xf32>
    %171 = tpu.matmul %168, %163, %cst_45 {dimension_numbers = #tpu.dot_dimension_numbers<[1], [0], [0], [1], [0, 0, 1, 1], [], []>} : vector<8x32xf32>, vector<32x128xf32>, vector<8x128xf32> -> vector<8x128xf32>
    %172 = arith.addf %170, %171 : vector<8x128xf32>
    %173 = arith.negf %172 : vector<8x128xf32>
    %174 = math.exp %173 : vector<8x128xf32>
    %cst_46 = arith.constant 1.000000e+00 : f32
    %175 = vector.broadcast %cst_46 : f32 to vector<8x128xf32>
    %176 = arith.addf %175, %174 : vector<8x128xf32>
    %177 = arith.divf %175, %176 : vector<8x128xf32>
    %178 = math.tanh %172 : vector<8x128xf32>
    %179 = vector.extract_strided_slice %177 {offsets = [0, 0], sizes = [8, 32], strides = [1, 1]} : vector<8x128xf32> to vector<8x32xf32>
    %180 = vector.extract_strided_slice %177 {offsets = [0, 32], sizes = [8, 32], strides = [1, 1]} : vector<8x128xf32> to vector<8x32xf32>
    %181 = vector.extract_strided_slice %178 {offsets = [0, 64], sizes = [8, 32], strides = [1, 1]} : vector<8x128xf32> to vector<8x32xf32>
    %182 = vector.extract_strided_slice %177 {offsets = [0, 96], sizes = [8, 32], strides = [1, 1]} : vector<8x128xf32> to vector<8x32xf32>
    %183 = arith.mulf %180, %169 : vector<8x32xf32>
    %184 = arith.mulf %179, %181 : vector<8x32xf32>
    %185 = arith.addf %183, %184 : vector<8x32xf32>
    %186 = math.tanh %185 : vector<8x32xf32>
    %187 = arith.mulf %182, %186 : vector<8x32xf32>
    %188 = vector.extract_strided_slice %167 {offsets = [8, 0], sizes = [8, 128], strides = [1, 1]} : vector<64x128xf32> to vector<8x128xf32>
    %cst_47 = arith.constant dense<0.000000e+00> : vector<8x128xf32>
    %189 = tpu.matmul %187, %163, %cst_47 {dimension_numbers = #tpu.dot_dimension_numbers<[1], [0], [0], [1], [0, 0, 1, 1], [], []>} : vector<8x32xf32>, vector<32x128xf32>, vector<8x128xf32> -> vector<8x128xf32>
    %190 = arith.addf %188, %189 : vector<8x128xf32>
    %191 = arith.negf %190 : vector<8x128xf32>
    %192 = math.exp %191 : vector<8x128xf32>
    %cst_48 = arith.constant 1.000000e+00 : f32
    %193 = vector.broadcast %cst_48 : f32 to vector<8x128xf32>
    %194 = arith.addf %193, %192 : vector<8x128xf32>
    %195 = arith.divf %193, %194 : vector<8x128xf32>
    %196 = math.tanh %190 : vector<8x128xf32>
    %197 = vector.extract_strided_slice %195 {offsets = [0, 0], sizes = [8, 32], strides = [1, 1]} : vector<8x128xf32> to vector<8x32xf32>
    %198 = vector.extract_strided_slice %195 {offsets = [0, 32], sizes = [8, 32], strides = [1, 1]} : vector<8x128xf32> to vector<8x32xf32>
    %199 = vector.extract_strided_slice %196 {offsets = [0, 64], sizes = [8, 32], strides = [1, 1]} : vector<8x128xf32> to vector<8x32xf32>
    %200 = vector.extract_strided_slice %195 {offsets = [0, 96], sizes = [8, 32], strides = [1, 1]} : vector<8x128xf32> to vector<8x32xf32>
    %201 = arith.mulf %198, %185 : vector<8x32xf32>
    %202 = arith.mulf %197, %199 : vector<8x32xf32>
    %203 = arith.addf %201, %202 : vector<8x32xf32>
    %204 = math.tanh %203 : vector<8x32xf32>
    %205 = arith.mulf %200, %204 : vector<8x32xf32>
    %206 = vector.extract_strided_slice %167 {offsets = [16, 0], sizes = [8, 128], strides = [1, 1]} : vector<64x128xf32> to vector<8x128xf32>
    %cst_49 = arith.constant dense<0.000000e+00> : vector<8x128xf32>
    %207 = tpu.matmul %205, %163, %cst_49 {dimension_numbers = #tpu.dot_dimension_numbers<[1], [0], [0], [1], [0, 0, 1, 1], [], []>} : vector<8x32xf32>, vector<32x128xf32>, vector<8x128xf32> -> vector<8x128xf32>
    %208 = arith.addf %206, %207 : vector<8x128xf32>
    %209 = arith.negf %208 : vector<8x128xf32>
    %210 = math.exp %209 : vector<8x128xf32>
    %cst_50 = arith.constant 1.000000e+00 : f32
    %211 = vector.broadcast %cst_50 : f32 to vector<8x128xf32>
    %212 = arith.addf %211, %210 : vector<8x128xf32>
    %213 = arith.divf %211, %212 : vector<8x128xf32>
    %214 = math.tanh %208 : vector<8x128xf32>
    %215 = vector.extract_strided_slice %213 {offsets = [0, 0], sizes = [8, 32], strides = [1, 1]} : vector<8x128xf32> to vector<8x32xf32>
    %216 = vector.extract_strided_slice %213 {offsets = [0, 32], sizes = [8, 32], strides = [1, 1]} : vector<8x128xf32> to vector<8x32xf32>
    %217 = vector.extract_strided_slice %214 {offsets = [0, 64], sizes = [8, 32], strides = [1, 1]} : vector<8x128xf32> to vector<8x32xf32>
    %218 = vector.extract_strided_slice %213 {offsets = [0, 96], sizes = [8, 32], strides = [1, 1]} : vector<8x128xf32> to vector<8x32xf32>
    %219 = arith.mulf %216, %203 : vector<8x32xf32>
    %220 = arith.mulf %215, %217 : vector<8x32xf32>
    %221 = arith.addf %219, %220 : vector<8x32xf32>
    %222 = math.tanh %221 : vector<8x32xf32>
    %223 = arith.mulf %218, %222 : vector<8x32xf32>
    %224 = vector.extract_strided_slice %167 {offsets = [24, 0], sizes = [8, 128], strides = [1, 1]} : vector<64x128xf32> to vector<8x128xf32>
    %cst_51 = arith.constant dense<0.000000e+00> : vector<8x128xf32>
    %225 = tpu.matmul %223, %163, %cst_51 {dimension_numbers = #tpu.dot_dimension_numbers<[1], [0], [0], [1], [0, 0, 1, 1], [], []>} : vector<8x32xf32>, vector<32x128xf32>, vector<8x128xf32> -> vector<8x128xf32>
    %226 = arith.addf %224, %225 : vector<8x128xf32>
    %227 = arith.negf %226 : vector<8x128xf32>
    %228 = math.exp %227 : vector<8x128xf32>
    %cst_52 = arith.constant 1.000000e+00 : f32
    %229 = vector.broadcast %cst_52 : f32 to vector<8x128xf32>
    %230 = arith.addf %229, %228 : vector<8x128xf32>
    %231 = arith.divf %229, %230 : vector<8x128xf32>
    %232 = math.tanh %226 : vector<8x128xf32>
    %233 = vector.extract_strided_slice %231 {offsets = [0, 0], sizes = [8, 32], strides = [1, 1]} : vector<8x128xf32> to vector<8x32xf32>
    %234 = vector.extract_strided_slice %231 {offsets = [0, 32], sizes = [8, 32], strides = [1, 1]} : vector<8x128xf32> to vector<8x32xf32>
    %235 = vector.extract_strided_slice %232 {offsets = [0, 64], sizes = [8, 32], strides = [1, 1]} : vector<8x128xf32> to vector<8x32xf32>
    %236 = vector.extract_strided_slice %231 {offsets = [0, 96], sizes = [8, 32], strides = [1, 1]} : vector<8x128xf32> to vector<8x32xf32>
    %237 = arith.mulf %234, %221 : vector<8x32xf32>
    %238 = arith.mulf %233, %235 : vector<8x32xf32>
    %239 = arith.addf %237, %238 : vector<8x32xf32>
    %240 = math.tanh %239 : vector<8x32xf32>
    %241 = arith.mulf %236, %240 : vector<8x32xf32>
    %242 = vector.extract_strided_slice %167 {offsets = [32, 0], sizes = [8, 128], strides = [1, 1]} : vector<64x128xf32> to vector<8x128xf32>
    %cst_53 = arith.constant dense<0.000000e+00> : vector<8x128xf32>
    %243 = tpu.matmul %241, %163, %cst_53 {dimension_numbers = #tpu.dot_dimension_numbers<[1], [0], [0], [1], [0, 0, 1, 1], [], []>} : vector<8x32xf32>, vector<32x128xf32>, vector<8x128xf32> -> vector<8x128xf32>
    %244 = arith.addf %242, %243 : vector<8x128xf32>
    %245 = arith.negf %244 : vector<8x128xf32>
    %246 = math.exp %245 : vector<8x128xf32>
    %cst_54 = arith.constant 1.000000e+00 : f32
    %247 = vector.broadcast %cst_54 : f32 to vector<8x128xf32>
    %248 = arith.addf %247, %246 : vector<8x128xf32>
    %249 = arith.divf %247, %248 : vector<8x128xf32>
    %250 = math.tanh %244 : vector<8x128xf32>
    %251 = vector.extract_strided_slice %249 {offsets = [0, 0], sizes = [8, 32], strides = [1, 1]} : vector<8x128xf32> to vector<8x32xf32>
    %252 = vector.extract_strided_slice %249 {offsets = [0, 32], sizes = [8, 32], strides = [1, 1]} : vector<8x128xf32> to vector<8x32xf32>
    %253 = vector.extract_strided_slice %250 {offsets = [0, 64], sizes = [8, 32], strides = [1, 1]} : vector<8x128xf32> to vector<8x32xf32>
    %254 = vector.extract_strided_slice %249 {offsets = [0, 96], sizes = [8, 32], strides = [1, 1]} : vector<8x128xf32> to vector<8x32xf32>
    %255 = arith.mulf %252, %239 : vector<8x32xf32>
    %256 = arith.mulf %251, %253 : vector<8x32xf32>
    %257 = arith.addf %255, %256 : vector<8x32xf32>
    %258 = math.tanh %257 : vector<8x32xf32>
    %259 = arith.mulf %254, %258 : vector<8x32xf32>
    %260 = vector.extract_strided_slice %167 {offsets = [40, 0], sizes = [8, 128], strides = [1, 1]} : vector<64x128xf32> to vector<8x128xf32>
    %cst_55 = arith.constant dense<0.000000e+00> : vector<8x128xf32>
    %261 = tpu.matmul %259, %163, %cst_55 {dimension_numbers = #tpu.dot_dimension_numbers<[1], [0], [0], [1], [0, 0, 1, 1], [], []>} : vector<8x32xf32>, vector<32x128xf32>, vector<8x128xf32> -> vector<8x128xf32>
    %262 = arith.addf %260, %261 : vector<8x128xf32>
    %263 = arith.negf %262 : vector<8x128xf32>
    %264 = math.exp %263 : vector<8x128xf32>
    %cst_56 = arith.constant 1.000000e+00 : f32
    %265 = vector.broadcast %cst_56 : f32 to vector<8x128xf32>
    %266 = arith.addf %265, %264 : vector<8x128xf32>
    %267 = arith.divf %265, %266 : vector<8x128xf32>
    %268 = math.tanh %262 : vector<8x128xf32>
    %269 = vector.extract_strided_slice %267 {offsets = [0, 0], sizes = [8, 32], strides = [1, 1]} : vector<8x128xf32> to vector<8x32xf32>
    %270 = vector.extract_strided_slice %267 {offsets = [0, 32], sizes = [8, 32], strides = [1, 1]} : vector<8x128xf32> to vector<8x32xf32>
    %271 = vector.extract_strided_slice %268 {offsets = [0, 64], sizes = [8, 32], strides = [1, 1]} : vector<8x128xf32> to vector<8x32xf32>
    %272 = vector.extract_strided_slice %267 {offsets = [0, 96], sizes = [8, 32], strides = [1, 1]} : vector<8x128xf32> to vector<8x32xf32>
    %273 = arith.mulf %270, %257 : vector<8x32xf32>
    %274 = arith.mulf %269, %271 : vector<8x32xf32>
    %275 = arith.addf %273, %274 : vector<8x32xf32>
    %276 = math.tanh %275 : vector<8x32xf32>
    %277 = arith.mulf %272, %276 : vector<8x32xf32>
    %278 = vector.extract_strided_slice %167 {offsets = [48, 0], sizes = [8, 128], strides = [1, 1]} : vector<64x128xf32> to vector<8x128xf32>
    %cst_57 = arith.constant dense<0.000000e+00> : vector<8x128xf32>
    %279 = tpu.matmul %277, %163, %cst_57 {dimension_numbers = #tpu.dot_dimension_numbers<[1], [0], [0], [1], [0, 0, 1, 1], [], []>} : vector<8x32xf32>, vector<32x128xf32>, vector<8x128xf32> -> vector<8x128xf32>
    %280 = arith.addf %278, %279 : vector<8x128xf32>
    %281 = arith.negf %280 : vector<8x128xf32>
    %282 = math.exp %281 : vector<8x128xf32>
    %cst_58 = arith.constant 1.000000e+00 : f32
    %283 = vector.broadcast %cst_58 : f32 to vector<8x128xf32>
    %284 = arith.addf %283, %282 : vector<8x128xf32>
    %285 = arith.divf %283, %284 : vector<8x128xf32>
    %286 = math.tanh %280 : vector<8x128xf32>
    %287 = vector.extract_strided_slice %285 {offsets = [0, 0], sizes = [8, 32], strides = [1, 1]} : vector<8x128xf32> to vector<8x32xf32>
    %288 = vector.extract_strided_slice %285 {offsets = [0, 32], sizes = [8, 32], strides = [1, 1]} : vector<8x128xf32> to vector<8x32xf32>
    %289 = vector.extract_strided_slice %286 {offsets = [0, 64], sizes = [8, 32], strides = [1, 1]} : vector<8x128xf32> to vector<8x32xf32>
    %290 = vector.extract_strided_slice %285 {offsets = [0, 96], sizes = [8, 32], strides = [1, 1]} : vector<8x128xf32> to vector<8x32xf32>
    %291 = arith.mulf %288, %275 : vector<8x32xf32>
    %292 = arith.mulf %287, %289 : vector<8x32xf32>
    %293 = arith.addf %291, %292 : vector<8x32xf32>
    %294 = math.tanh %293 : vector<8x32xf32>
    %295 = arith.mulf %290, %294 : vector<8x32xf32>
    %296 = vector.extract_strided_slice %167 {offsets = [56, 0], sizes = [8, 128], strides = [1, 1]} : vector<64x128xf32> to vector<8x128xf32>
    %cst_59 = arith.constant dense<0.000000e+00> : vector<8x128xf32>
    %297 = tpu.matmul %295, %163, %cst_59 {dimension_numbers = #tpu.dot_dimension_numbers<[1], [0], [0], [1], [0, 0, 1, 1], [], []>} : vector<8x32xf32>, vector<32x128xf32>, vector<8x128xf32> -> vector<8x128xf32>
    %298 = arith.addf %296, %297 : vector<8x128xf32>
    %299 = arith.negf %298 : vector<8x128xf32>
    %300 = math.exp %299 : vector<8x128xf32>
    %cst_60 = arith.constant 1.000000e+00 : f32
    %301 = vector.broadcast %cst_60 : f32 to vector<8x128xf32>
    %302 = arith.addf %301, %300 : vector<8x128xf32>
    %303 = arith.divf %301, %302 : vector<8x128xf32>
    %304 = math.tanh %298 : vector<8x128xf32>
    %305 = vector.extract_strided_slice %303 {offsets = [0, 0], sizes = [8, 32], strides = [1, 1]} : vector<8x128xf32> to vector<8x32xf32>
    %306 = vector.extract_strided_slice %303 {offsets = [0, 32], sizes = [8, 32], strides = [1, 1]} : vector<8x128xf32> to vector<8x32xf32>
    %307 = vector.extract_strided_slice %304 {offsets = [0, 64], sizes = [8, 32], strides = [1, 1]} : vector<8x128xf32> to vector<8x32xf32>
    %308 = vector.extract_strided_slice %303 {offsets = [0, 96], sizes = [8, 32], strides = [1, 1]} : vector<8x128xf32> to vector<8x32xf32>
    %309 = arith.mulf %306, %293 : vector<8x32xf32>
    %310 = arith.mulf %305, %307 : vector<8x32xf32>
    %311 = arith.addf %309, %310 : vector<8x32xf32>
    %312 = math.tanh %311 : vector<8x32xf32>
    %313 = arith.mulf %308, %312 : vector<8x32xf32>
    %c0_61 = arith.constant 0 : index
    %c0_62 = arith.constant 0 : index
    %314 = vector.load %arg7[%c0_61, %c0_62] : memref<32x2xf32, #tpu.memory_space<vmem>>, vector<32x2xf32>
    %cst_63 = arith.constant dense<0.000000e+00> : vector<8x2xf32>
    %315 = tpu.matmul %313, %314, %cst_63 {dimension_numbers = #tpu.dot_dimension_numbers<[1], [0], [0], [1], [0, 0, 1, 1], [], []>} : vector<8x32xf32>, vector<32x2xf32>, vector<8x2xf32> -> vector<8x2xf32>
    %c0_64 = arith.constant 0 : index
    %c0_65 = arith.constant 0 : index
    %316 = vector.load %arg8[%c0_64, %c0_65] : memref<1x2xf32, #tpu.memory_space<vmem>>, vector<1x2xf32>
    %317 = vector.broadcast %316 : vector<1x2xf32> to vector<8x2xf32>
    %318 = arith.addf %315, %317 : vector<8x2xf32>
    %c0_66 = arith.constant 0 : index
    %c0_67 = arith.constant 0 : index
    %319 = vector.load %arg9[%c0_66, %c0_67] : memref<8x2xf32, #tpu.memory_space<vmem>>, vector<8x2xf32>
    tpu.vector_store %arg9[%c0_66, %c0_67], %318 {strides = array<i32>} : memref<8x2xf32, #tpu.memory_space<vmem>>, vector<8x2xf32>,
    return
  }
}

</mosaic_0001>

<bundles_post_ra>
// kernel: lstm_model_forward.1
= control target key start
LH: loop header
LB: loop body
LE: loop exit
PB: predicated region body
PF: predicated region fallthrough
CT: control target
= control target key end

     0   :  { %vm50_vm0 = vcmask 130048   ;;  %v1443_v7 = vmov 0.0   ;;  %s1444_s23 = smov 64   ;;  %s1445_s24 = smov 32   ;;  %vm116_vm5 = vcmask 261120   ;;  %s1814_s2 = inlined_call_operand.vmem [shape: f32[32,128], index: 2, kind: input, shape index: {}]   ;;  %s1815_s1 = inlined_call_operand.vmem [shape: f32[16,128], index: 1, kind: input, shape index: {}]   ;;  %s1816_s0 = inlined_call_operand.vmem [shape: f32[64,16], index: 0, kind: input, shape index: {}]   ;;  %s1817_s3 = inlined_call_operand.vmem [shape: f32[1,128], index: 3, kind: input, shape index: {}]   ;;  %s1818_s4 = inlined_call_operand.vmem [shape: f32[32,128], index: 4, kind: input, shape index: {}]   ;;  %s1819_s6 = inlined_call_operand.vmem [shape: f32[1,128], index: 6, kind: input, shape index: {}]   ;;  %s1820_s5 = inlined_call_operand.vmem [shape: f32[32,128], index: 5, kind: input, shape index: {}]   ;;  %s1821_s7 = inlined_call_operand.vmem [shape: f32[32,2], index: 7, kind: input, shape index: {}]   ;;  %s1822_s8 = inlined_call_operand.vmem [shape: f32[1,2], index: 8, kind: input, shape index: {}]   ;;  %s1823_s9 = inlined_call_operand.vmem [shape: f32[8,2], index: 9, kind: output, shape index: {}]  }
   0x1   :  { %v1499_v0 = vld [vmem:[%s1814_s2 + $0x18] sm:$0xff]  ;;  %v41_v1 = vld [vmem:[%s1815_s1 + $0x8] sm:$0xff]  ;;  %v1507_v2 = vld [vmem:[%s1814_s2 + $0x10] sm:$0xff] }
   0x2   :  { %132 = vmatpush.msra.mxu1 %v1499_v0  ;;  %89 = vmatpush.msra.mxu0 %v41_v1  ;;  %v40_v3 = vld [vmem:[%s1815_s1] sm:$0xff]  ;;  %v1519_v5 = vld [vmem:[%s1814_s2 + $0x8] sm:$0xff]  ;;  %v649_v35 = vld [vmem:[%s1818_s4 + $0x18] sm:$0xff] }
   0x3   :  { %v32_v4 = vld [vmem:[%s1816_s0] sm:$0xff]  ;;  %197 = vmatpush.msra.mxu2 %v1499_v0  ;;  %v648_v36 = vld [vmem:[%s1818_s4 + $0x10] sm:$0xff]  ;;  %v33_v37 = vld [vmem:[%s1816_s0 + $0x8] sm:$0xff]  ;;  %694 = vmatpush.msra.mxu3 %v649_v35 }
   0x4   :  { %133 = vmatpush.msra.mxu1 %v1507_v2  ;;  %90 = vmatpush.msra.mxu0 %v40_v3  ;;  %v1527_v6 = vld [vmem:[%s1814_s2] sm:$0xff]  ;;  %v647_v38 = vld [vmem:[%s1818_s4 + $0x8] sm:$0xff] }
   0x5   :  { %1261 = vmatmul.msk.f32.vlgmr.msra.gmra.mxu0 %vm50_vm0, %v32_v4  ;;  %198 = vmatpush.msra.mxu2 %v1507_v2  ;;  %v1554_v8 = vld [vmem:[%s1817_s3] ss:$0 sm:$0xff] }
   0x6   :  { %134 = vmatpush.msra.mxu1 %v1519_v5  ;;  %457 = vmatpush.msrb.mxu0 %v1499_v0  ;;  %v646_v39 = vld [vmem:[%s1818_s4] sm:$0xff] }
   0x7   :  { %199 = vmatpush.msra.mxu2 %v1519_v5  ;;  %695 = vmatpush.msra.mxu3 %v648_v36 }
   0x8   :  { %135 = vmatpush.msra.mxu1 %v1527_v6  ;;  %458 = vmatpush.msrb.mxu0 %v1507_v2 }
   0x9   :  { %136 = vmatmul.f32.vlgmr.msra.gmra.mxu1 %v1443_v7  ;;  %200 = vmatpush.msra.mxu2 %v1527_v6 }
   0xa   :  { %327 = vmatpush.msrb.mxu1 %v1499_v0  ;;  %459 = vmatpush.msrb.mxu0 %v1519_v5 }
   0xb   :  { %262 = vmatpush.msrb.mxu2 %v1499_v0  ;;  %696 = vmatpush.msra.mxu3 %v647_v38 }
   0xc   :  { %328 = vmatpush.msrb.mxu1 %v1507_v2  ;;  %460 = vmatpush.msrb.mxu0 %v1527_v6 }
   0xd   :  { %263 = vmatpush.msrb.mxu2 %v1507_v2  ;;  %1262 = vmatmul.msk.f32.gmra.mxu0 %vm50_vm0, %v33_v37 }
   0xe   :  { %329 = vmatpush.msrb.mxu1 %v1519_v5  ;;  %697 = vmatpush.msra.mxu3 %v646_v39 }
   0xf   :  { %264 = vmatpush.msrb.mxu2 %v1519_v5 }
  0x10   :  { %330 = vmatpush.msrb.mxu1 %v1527_v6 }
  0x11   :  { %265 = vmatpush.msrb.mxu2 %v1527_v6 }
  0x12   :  { %522 = vmatpush.msra.mxu1 %v1499_v0 }
  0x14   :  { %523 = vmatpush.msra.mxu1 %v1507_v2 }
  0x16   :  { %524 = vmatpush.msra.mxu1 %v1519_v5 }
  0x18   :  { %525 = vmatpush.msra.mxu1 %v1527_v6 }
  0x82   :  { %v92_v9 = vpop.f32.mrf.mxu0 }
  0x83   :  { %v93_v10 = vadd.f32 %v1554_v8, %v92_v9 }
  0x86   :  { %v137_v11 = vpop.f32.mrf.mxu1 }
  0x87   :  { %v140_v12 = vadd.f32 %v137_v11, %v93_v10  ;;  %v34_v10 = vld [vmem:[%s1816_s0 + $0x10] sm:$0xff] }
  0x88   :  { %1263 = vmatmul.msk.f32.gmra.mxu0 %vm50_vm0, %v34_v10 }
  0x89   :  { %1314 = vtanh.f32 %v140_v12  ;;  %v1269_v14 = vmul.f32 -1.442695, %v140_v12 }
  0x8a   :  { %v95_v42 = vpop.f32.mrf.mxu0 }
  0x8b   :  { %1316 = vpow2.f32 %v1269_v14  ;;  %v96_v43 = vadd.f32 %v1554_v8, %v95_v42 }
  0x8f   :  { %v1315_v13 = vpop.eup %1314 }
  0x90   :  { %163 = vrot.lane.b32.xlu0 %v1315_v13, %s1444_s23 }
  0x91   :  { %v1317_v15 = vpop.eup %1316 }
  0x92   :  { %v144_v16 = vadd.f32 1.0, %v1317_v15 }
  0x94   :  { %1318 = vrcp.f32 %v144_v16  ;;  %v156_v22 = vand.u32 2147483648, %v144_v16  ;;  %vm150_vm2 = vweird.f32 %v144_v16  ;;  %v154_v23 = vand.u32 2147483647, %v144_v16 }
  0x96   :  { %v157_v25 = vor.u32 1.1754944e-38, %v156_v22  ;;  %vm155_vm4 = vcmp.eq.f32.partialorder %v154_v23, 8.507059e+37 }
  0x9a   :  { %v1319_v17 = vpop.eup %1318 }
  0x9b   :  { %v146_v18 = vmul.f32 %v1319_v17, %v144_v16  ;;  %vm151_vm1 = vweird.f32 %v1319_v17 }
  0x9c   :  { %vm152_vm3 = vmor %vm150_vm2, %vm151_vm1 }
  0x9d   :  { %v147_v19 = vsub.f32 1.0, %v146_v18 }
  0x9f   :  { %v148_v20 = vmul.f32 %v1319_v17, %v147_v19 }
  0xa1   :  { %v149_v21 = vadd.f32 %v1319_v17, %v148_v20 }
  0xa3   :  { %v153_v24 = vsel %vm152_vm3, %v1319_v17, %v149_v21 }
  0xa4   :  { %v158_v27 = vsel %vm155_vm4, %v157_v25, %v153_v24 }
  0xa5   :  { %v161_v29 = vmul.f32 0.0, %v158_v27 }
 0x102   :  { %v164_v26 = vpop.permute.xlu0 %163 }
 0x103   :  { %v166_v28 = vmul.f32 %v164_v26, %v158_v27 }
 0x105   :  { %168 = vrot.lane.b32.xlu0 %v166_v28, %s1445_s24  ;;  %v98_v13 = vpop.f32.mrf.mxu0 }
 0x106   :  { %v99_v14 = vadd.f32 %v1554_v8, %v98_v13 }
 0x177   :  { %v169_v30 = vpop.permute.xlu0 %168 }
 0x178   :  { %v171_v31 = vadd.f32 %v169_v30, %v161_v29 }
 0x17a   :  { %1320 = vtanh.f32 %v171_v31 }
 0x180   :  { %v1321_v32 = vpop.eup %1320 }
 0x181   :  { %174 = vrot.lane.b32.xlu1 %v1321_v32, %s1444_s23 }
 0x1f3   :  { %v175_v33 = vpop.permute.xlu1 %174 }
 0x1f4   :  { %v177_v34 = vmul.f32 %v175_v33, %v158_v27  ;;  %v35_v33 = vld [vmem:[%s1816_s0 + $0x18] sm:$0xff] }
 0x1f5   :  { %1264 = vmatmul.msk.f32.gmra.mxu0 %vm50_vm0, %v35_v33 }
 0x1f6   :  { %179 = vrot.lane.b32.xlu1 %v177_v34, %s1445_s24 }
 0x268   :  { %v180_v40 = vpop.permute.xlu1 %179 }
 0x269   :  { %182 = vst.msk [vmem:[#allocation2] sm:$0xff] %vm116_vm5, %v180_v40  ;;  %1270 = vmatmul.msk.f32.vlgmr.msra.gmra.mxu2 %vm116_vm5, %v180_v40 }
 0x26a   :  { %392 = vmatpush.msra.mxu2 %v1499_v0 }
 0x26c   :  { %393 = vmatpush.msra.mxu2 %v1507_v2 }
 0x26e   :  { %394 = vmatpush.msra.mxu2 %v1519_v5 }
 0x270   :  { %v638_v41 = vld [vmem:[#allocation2] sm:$0xff]  ;;  %395 = vmatpush.msra.mxu2 %v1527_v6 }
 0x271   :  { %1284 = vmatmul.msk.f32.vlgmr.msra.gmra.mxu3 %vm116_vm5, %v638_v41 }
 0x272   :  { %v101_v38 = vpop.f32.mrf.mxu0 }
 0x273   :  { %v102_v39 = vadd.f32 %v1554_v8, %v101_v38 }
 0x2ec   :  { %v202_v44 = vpop.f32.mrf.mxu2 }
 0x2ed   :  { %v205_v45 = vadd.f32 %v202_v44, %v96_v43 }
 0x2ef   :  { %1322 = vtanh.f32 %v205_v45  ;;  %v1271_v47 = vmul.f32 -1.442695, %v205_v45 }
 0x2f1   :  { %1324 = vpow2.f32 %v1271_v47 }
 0x2f5   :  { %v1323_v46 = vpop.eup %1322 }
 0x2f6   :  { %228 = vrot.lane.b32.xlu2 %v1323_v46, %s1444_s23 }
 0x2f7   :  { %v1325_v48 = vpop.eup %1324 }
 0x2f8   :  { %v209_v49 = vadd.f32 1.0, %v1325_v48 }
 0x2fa   :  { %1326 = vrcp.f32 %v209_v49  ;;  %v221_v55 = vand.u32 2147483648, %v209_v49  ;;  %vm215_vm7 = vweird.f32 %v209_v49  ;;  %v219_v56 = vand.u32 2147483647, %v209_v49 }
 0x2fc   :  { %v222_v58 = vor.u32 1.1754944e-38, %v221_v55  ;;  %vm220_vm9 = vcmp.eq.f32.partialorder %v219_v56, 8.507059e+37 }
 0x300   :  { %v1327_v50 = vpop.eup %1326 }
 0x301   :  { %v211_v51 = vmul.f32 %v1327_v50, %v209_v49  ;;  %vm216_vm6 = vweird.f32 %v1327_v50 }
 0x302   :  { %vm217_vm8 = vmor %vm215_vm7, %vm216_vm6 }
 0x303   :  { %v212_v52 = vsub.f32 1.0, %v211_v51 }
 0x305   :  { %v213_v53 = vmul.f32 %v1327_v50, %v212_v52 }
 0x307   :  { %v214_v54 = vadd.f32 %v1327_v50, %v213_v53 }
 0x309   :  { %v218_v57 = vsel %vm217_vm8, %v1327_v50, %v214_v54 }
 0x30a   :  { %v223_v60 = vsel %vm220_vm9, %v222_v58, %v218_v57 }
 0x30b   :  { %v226_v62 = vmul.f32 %v223_v60, %v171_v31 }
 0x350   :  { %v229_v59 = vpop.permute.xlu2 %228 }
 0x351   :  { %v231_v61 = vmul.f32 %v229_v59, %v223_v60 }
 0x353   :  { %233 = vrot.lane.b32.xlu2 %v231_v61, %s1445_s24 }
 0x3ad   :  { %v234_v63 = vpop.permute.xlu2 %233 }
 0x3ae   :  { %v236_v1 = vadd.f32 %v234_v63, %v226_v62 }
 0x3b0   :  { %1328 = vtanh.f32 %v236_v1 }
 0x3b6   :  { %v1329_v3 = vpop.eup %1328 }
 0x3b7   :  { %239 = vrot.lane.b32.xlu0 %v1329_v3, %s1444_s23 }
 0x429   :  { %v240_v4 = vpop.permute.xlu0 %239 }
 0x42a   :  { %v242_v9 = vmul.f32 %v240_v4, %v223_v60 }
 0x42c   :  { %244 = vrot.lane.b32.xlu1 %v242_v9, %s1445_s24 }
 0x49e   :  { %v245_v11 = vpop.permute.xlu1 %244 }
 0x49f   :  { %247 = vst.msk [vmem:[#allocation2 + $0x8] sm:$0xff] %vm116_vm5, %v245_v11  ;;  %1272 = vmatmul.msk.f32.vlgmr.msrb.gmra.mxu2 %vm116_vm5, %v245_v11 }
 0x4a0   :  { %587 = vmatpush.msrb.mxu2 %v1499_v0 }
 0x4a2   :  { %588 = vmatpush.msrb.mxu2 %v1507_v2 }
 0x4a4   :  { %589 = vmatpush.msrb.mxu2 %v1519_v5 }
 0x4a6   :  { %v639_v12 = vld [vmem:[#allocation2 + $0x8] sm:$0xff]  ;;  %590 = vmatpush.msrb.mxu2 %v1527_v6 }
 0x4a7   :  { %1285 = vmatmul.msk.f32.gmra.mxu3 %vm116_vm5, %v639_v12 }
 0x522   :  { %v267_v15 = vpop.f32.mrf.mxu2 }
 0x523   :  { %v270_v16 = vadd.f32 %v267_v15, %v99_v14 }
 0x525   :  { %1330 = vtanh.f32 %v270_v16  ;;  %v1273_v18 = vmul.f32 -1.442695, %v270_v16 }
 0x527   :  { %1332 = vpow2.f32 %v1273_v18 }
 0x52b   :  { %v1331_v17 = vpop.eup %1330 }
 0x52c   :  { %293 = vrot.lane.b32.xlu2 %v1331_v17, %s1444_s23 }
 0x52d   :  { %v1333_v0 = vpop.eup %1332 }
 0x52e   :  { %v274_v2 = vadd.f32 1.0, %v1333_v0 }
 0x530   :  { %1334 = vrcp.f32 %v274_v2  ;;  %v286_v22 = vand.u32 2147483648, %v274_v2  ;;  %vm280_vm11 = vweird.f32 %v274_v2  ;;  %v284_v23 = vand.u32 2147483647, %v274_v2 }
 0x532   :  { %v287_v25 = vor.u32 1.1754944e-38, %v286_v22  ;;  %vm285_vm13 = vcmp.eq.f32.partialorder %v284_v23, 8.507059e+37 }
 0x536   :  { %v1335_v5 = vpop.eup %1334 }
 0x537   :  { %v276_v19 = vmul.f32 %v1335_v5, %v274_v2  ;;  %vm281_vm10 = vweird.f32 %v1335_v5 }
 0x538   :  { %vm282_vm12 = vmor %vm280_vm11, %vm281_vm10 }
 0x539   :  { %v277_v20 = vsub.f32 1.0, %v276_v19 }
 0x53b   :  { %v278_v6 = vmul.f32 %v1335_v5, %v277_v20 }
 0x53d   :  { %v279_v21 = vadd.f32 %v1335_v5, %v278_v6 }
 0x53f   :  { %v283_v24 = vsel %vm282_vm12, %v1335_v5, %v279_v21 }
 0x540   :  { %v288_v27 = vsel %vm285_vm13, %v287_v25, %v283_v24 }
 0x541   :  { %v291_v29 = vmul.f32 %v288_v27, %v236_v1  ;;  %v36_v1 = vld [vmem:[%s1816_s0 + $0x20] sm:$0xff] }
 0x542   :  { %1265 = vmatmul.msk.f32.gmra.mxu0 %vm50_vm0, %v36_v1  ;;  %v1659_v1 = vld [vmem:[%s1820_s5 + $0x18] sm:$0xff] }
 0x586   :  { %v294_v26 = vpop.permute.xlu2 %293 }
 0x587   :  { %v296_v28 = vmul.f32 %v294_v26, %v288_v27 }
 0x589   :  { %298 = vrot.lane.b32.xlu0 %v296_v28, %s1445_s24 }
 0x5bf   :  { %v104_v9 = vpop.f32.mrf.mxu0 }
 0x5c0   :  { %v105_v10 = vadd.f32 %v1554_v8, %v104_v9  ;;  %v1678_v9 = vld [vmem:[%s1820_s5] sm:$0xff] }
 0x5fb   :  { %v299_v30 = vpop.permute.xlu0 %298 }
 0x5fc   :  { %v301_v31 = vadd.f32 %v299_v30, %v291_v29  ;;  %v37_v29 = vld [vmem:[%s1816_s0 + $0x28] sm:$0xff]  ;;  %v38_v30 = vld [vmem:[%s1816_s0 + $0x30] sm:$0xff] }
 0x5fd   :  { %1266 = vmatmul.msk.f32.gmra.mxu0 %vm50_vm0, %v37_v29 }
 0x5fe   :  { %1336 = vtanh.f32 %v301_v31 }
 0x604   :  { %v1337_v32 = vpop.eup %1336 }
 0x605   :  { %304 = vrot.lane.b32.xlu1 %v1337_v32, %s1444_s23  ;;  %1267 = vmatmul.msk.f32.gmra.mxu0 %vm50_vm0, %v38_v30 }
 0x677   :  { %v305_v34 = vpop.permute.xlu1 %304 }
 0x678   :  { %v307_v35 = vmul.f32 %v305_v34, %v288_v27 }
 0x67a   :  { %309 = vrot.lane.b32.xlu2 %v307_v35, %s1445_s24 }
 0x6d4   :  { %v310_v36 = vpop.permute.xlu2 %309 }
 0x6d5   :  { %312 = vst.msk [vmem:[#allocation2 + $0x10] sm:$0xff] %vm116_vm5, %v310_v36  ;;  %1274 = vmatmul.msk.f32.vlgmr.msrb.gmra.mxu1 %vm116_vm5, %v310_v36  ;;  %v107_v36 = vpop.f32.mrf.mxu0 }
 0x6d6   :  { %735 = vmatpush.msrb.mxu1 %v1659_v1 }
 0x6dc   :  { %v640_v37 = vld [vmem:[#allocation2 + $0x10] sm:$0xff] }
 0x6dd   :  { %1286 = vmatmul.msk.f32.gmra.mxu3 %vm116_vm5, %v640_v37  ;;  %v1644_v37 = vpop.f32.mrf.mxu0 }
 0x752   :  { %v332_v40 = vpop.f32.mrf.mxu1 }
 0x753   :  { %v335_v41 = vadd.f32 %v332_v40, %v102_v39  ;;  %v108_v39 = vadd.f32 %v1554_v8, %v107_v36 }
 0x755   :  { %1338 = vtanh.f32 %v335_v41  ;;  %v1275_v43 = vmul.f32 -1.442695, %v335_v41 }
 0x757   :  { %1340 = vpow2.f32 %v1275_v43 }
 0x75b   :  { %v1339_v42 = vpop.eup %1338 }
 0x75c   :  { %358 = vrot.lane.b32.xlu0 %v1339_v42, %s1444_s23 }
 0x75d   :  { %v1341_v44 = vpop.eup %1340 }
 0x75e   :  { %v339_v45 = vadd.f32 1.0, %v1341_v44 }
 0x760   :  { %1342 = vrcp.f32 %v339_v45  ;;  %v351_v51 = vand.u32 2147483648, %v339_v45  ;;  %vm345_vm15 = vweird.f32 %v339_v45  ;;  %v349_v52 = vand.u32 2147483647, %v339_v45 }
 0x762   :  { %v352_v54 = vor.u32 1.1754944e-38, %v351_v51  ;;  %vm350_vm2 = vcmp.eq.f32.partialorder %v349_v52, 8.507059e+37 }
 0x766   :  { %v1343_v46 = vpop.eup %1342 }
 0x767   :  { %v341_v47 = vmul.f32 %v1343_v46, %v339_v45  ;;  %vm346_vm14 = vweird.f32 %v1343_v46 }
 0x768   :  { %vm347_vm1 = vmor %vm345_vm15, %vm346_vm14 }
 0x769   :  { %v342_v48 = vsub.f32 1.0, %v341_v47 }
 0x76b   :  { %v343_v49 = vmul.f32 %v1343_v46, %v342_v48 }
 0x76d   :  { %v344_v50 = vadd.f32 %v1343_v46, %v343_v49 }
 0x76f   :  { %v348_v53 = vsel %vm347_vm1, %v1343_v46, %v344_v50 }
 0x770   :  { %v353_v56 = vsel %vm350_vm2, %v352_v54, %v348_v53 }
 0x771   :  { %v356_v58 = vmul.f32 %v353_v56, %v301_v31  ;;  %v39_v31 = vld [vmem:[%s1816_s0 + $0x38] sm:$0xff] }
 0x772   :  { %1268 = vmatmul.msk.f32.gmra.mxu0 %vm50_vm0, %v39_v31 }
 0x7ce   :  { %v359_v55 = vpop.permute.xlu0 %358 }
 0x7cf   :  { %v361_v57 = vmul.f32 %v359_v55, %v353_v56 }
 0x7d1   :  { %363 = vrot.lane.b32.xlu1 %v361_v57, %s1445_s24 }
 0x7ef   :  { %v1646_v38 = vpop.f32.mrf.mxu0 }
 0x843   :  { %v364_v59 = vpop.permute.xlu1 %363 }
 0x844   :  { %v366_v60 = vadd.f32 %v364_v59, %v356_v58 }
 0x846   :  { %1344 = vtanh.f32 %v366_v60 }
 0x84c   :  { %v1345_v61 = vpop.eup %1344 }
 0x84d   :  { %369 = vrot.lane.b32.xlu2 %v1345_v61, %s1444_s23 }
 0x8a7   :  { %v370_v62 = vpop.permute.xlu2 %369 }
 0x8a8   :  { %v372_v63 = vmul.f32 %v370_v62, %v353_v56 }
 0x8aa   :  { %374 = vrot.lane.b32.xlu0 %v372_v63, %s1445_s24 }
 0x91c   :  { %v375_v3 = vpop.permute.xlu0 %374 }
 0x91d   :  { %377 = vst.msk [vmem:[#allocation2 + $0x18] sm:$0xff] %vm116_vm5, %v375_v3  ;;  %1276 = vmatmul.msk.f32.vlgmr.msra.gmra.mxu2 %vm116_vm5, %v375_v3  ;;  %v1664_v3 = vld [vmem:[%s1820_s5 + $0x10] sm:$0xff] }
 0x91e   :  { %798 = vmatpush.msra.mxu2 %v1659_v1  ;;  %736 = vmatpush.msrb.mxu1 %v1664_v3 }
 0x920   :  { %799 = vmatpush.msra.mxu2 %v1664_v3 }
 0x924   :  { %v641_v4 = vld [vmem:[#allocation2 + $0x18] sm:$0xff] }
 0x925   :  { %1287 = vmatmul.msk.f32.gmra.mxu3 %vm116_vm5, %v641_v4  ;;  %v1671_v4 = vld [vmem:[%s1820_s5 + $0x8] sm:$0xff] }
 0x926   :  { %737 = vmatpush.msrb.mxu1 %v1671_v4  ;;  %800 = vmatpush.msra.mxu2 %v1671_v4 }
 0x928   :  { %738 = vmatpush.msrb.mxu1 %v1678_v9  ;;  %801 = vmatpush.msra.mxu2 %v1678_v9 }
 0x9a0   :  { %v397_v11 = vpop.f32.mrf.mxu2 }
 0x9a1   :  { %v400_v12 = vadd.f32 %v397_v11, %v105_v10 }
 0x9a3   :  { %1346 = vtanh.f32 %v400_v12  ;;  %v1277_v14 = vmul.f32 -1.442695, %v400_v12  ;;  %v111_v12 = vadd.f32 %v1554_v8, %v1644_v37 }
 0x9a5   :  { %1348 = vpow2.f32 %v1277_v14 }
 0x9a9   :  { %v1347_v13 = vpop.eup %1346 }
 0x9aa   :  { %423 = vrot.lane.b32.xlu1 %v1347_v13, %s1444_s23 }
 0x9ab   :  { %v1349_v15 = vpop.eup %1348 }
 0x9ac   :  { %v404_v16 = vadd.f32 1.0, %v1349_v15  ;;  %v1701_v15 = vld [vmem:[%s1819_s6] ss:$0 sm:$0xff] }
 0x9ae   :  { %1350 = vrcp.f32 %v404_v16  ;;  %v416_v19 = vand.u32 2147483648, %v404_v16  ;;  %vm410_vm4 = vweird.f32 %v404_v16  ;;  %v414_v20 = vand.u32 2147483647, %v404_v16 }
 0x9b0   :  { %v417_v21 = vor.u32 1.1754944e-38, %v416_v19  ;;  %vm415_vm7 = vcmp.eq.f32.partialorder %v414_v20, 8.507059e+37 }
 0x9b4   :  { %v1351_v17 = vpop.eup %1350 }
 0x9b5   :  { %v406_v18 = vmul.f32 %v1351_v17, %v404_v16  ;;  %vm411_vm3 = vweird.f32 %v1351_v17 }
 0x9b6   :  { %vm412_vm6 = vmor %vm410_vm4, %vm411_vm3 }
 0x9b7   :  { %v407_v0 = vsub.f32 1.0, %v406_v18 }
 0x9b9   :  { %v408_v2 = vmul.f32 %v1351_v17, %v407_v0 }
 0x9bb   :  { %v409_v5 = vadd.f32 %v1351_v17, %v408_v2 }
 0x9bd   :  { %v413_v6 = vsel %vm412_vm6, %v1351_v17, %v409_v5 }
 0x9be   :  { %v418_v23 = vsel %vm415_vm7, %v417_v21, %v413_v6 }
 0x9bf   :  { %v421_v25 = vmul.f32 %v418_v23, %v366_v60 }
 0xa1c   :  { %v424_v22 = vpop.permute.xlu1 %423 }
 0xa1d   :  { %v426_v24 = vmul.f32 %v424_v22, %v418_v23 }
 0xa1f   :  { %428 = vrot.lane.b32.xlu2 %v426_v24, %s1445_s24 }
 0xa79   :  { %v429_v26 = vpop.permute.xlu2 %428 }
 0xa7a   :  { %v431_v27 = vadd.f32 %v429_v26, %v421_v25 }
 0xa7c   :  { %1352 = vtanh.f32 %v431_v27 }
 0xa82   :  { %v1353_v28 = vpop.eup %1352 }
 0xa83   :  { %434 = vrot.lane.b32.xlu0 %v1353_v28, %s1444_s23 }
 0xaf5   :  { %v435_v32 = vpop.permute.xlu0 %434 }
 0xaf6   :  { %v437_v33 = vmul.f32 %v435_v32, %v418_v23 }
 0xaf8   :  { %439 = vrot.lane.b32.xlu1 %v437_v33, %s1445_s24 }
 0xb6a   :  { %v440_v34 = vpop.permute.xlu1 %439 }
 0xb6b   :  { %442 = vst.msk [vmem:[#allocation2 + $0x20] sm:$0xff] %vm116_vm5, %v440_v34  ;;  %1278 = vmatmul.msk.f32.vlgmr.msrb.gmra.mxu0 %vm116_vm5, %v440_v34 }
 0xb72   :  { %v642_v35 = vld [vmem:[#allocation2 + $0x20] sm:$0xff] }
 0xb73   :  { %1288 = vmatmul.msk.f32.gmra.mxu3 %vm116_vm5, %v642_v35 }
 0xbe8   :  { %v462_v40 = vpop.f32.mrf.mxu0 }
 0xbe9   :  { %v465_v41 = vadd.f32 %v462_v40, %v108_v39 }
 0xbeb   :  { %1354 = vtanh.f32 %v465_v41  ;;  %v1279_v43 = vmul.f32 -1.442695, %v465_v41 }
 0xbed   :  { %1356 = vpow2.f32 %v1279_v43 }
 0xbf1   :  { %v1355_v42 = vpop.eup %1354 }
 0xbf2   :  { %488 = vrot.lane.b32.xlu2 %v1355_v42, %s1444_s23 }
 0xbf3   :  { %v1357_v44 = vpop.eup %1356 }
 0xbf4   :  { %v469_v45 = vadd.f32 1.0, %v1357_v44 }
 0xbf6   :  { %1358 = vrcp.f32 %v469_v45  ;;  %v481_v51 = vand.u32 2147483648, %v469_v45  ;;  %vm475_vm8 = vweird.f32 %v469_v45  ;;  %v479_v52 = vand.u32 2147483647, %v469_v45 }
 0xbf8   :  { %v482_v54 = vor.u32 1.1754944e-38, %v481_v51  ;;  %vm480_vm10 = vcmp.eq.f32.partialorder %v479_v52, 8.507059e+37 }
 0xbfc   :  { %v1359_v46 = vpop.eup %1358 }
 0xbfd   :  { %v471_v47 = vmul.f32 %v1359_v46, %v469_v45  ;;  %vm476_vm0 = vweird.f32 %v1359_v46 }
 0xbfe   :  { %vm477_vm9 = vmor %vm475_vm8, %vm476_vm0 }
 0xbff   :  { %v472_v48 = vsub.f32 1.0, %v471_v47 }
 0xc01   :  { %v473_v49 = vmul.f32 %v1359_v46, %v472_v48 }
 0xc03   :  { %v474_v50 = vadd.f32 %v1359_v46, %v473_v49 }
 0xc05   :  { %v478_v53 = vsel %vm477_vm9, %v1359_v46, %v474_v50 }
 0xc06   :  { %v483_v56 = vsel %vm480_vm10, %v482_v54, %v478_v53 }
 0xc07   :  { %v486_v58 = vmul.f32 %v483_v56, %v431_v27 }
 0xc4c   :  { %v489_v55 = vpop.permute.xlu2 %488 }
 0xc4d   :  { %v491_v57 = vmul.f32 %v489_v55, %v483_v56 }
 0xc4f   :  { %493 = vrot.lane.b32.xlu0 %v491_v57, %s1445_s24 }
 0xcc1   :  { %v494_v59 = vpop.permute.xlu0 %493 }
 0xcc2   :  { %v1651_v60 = vadd.f32 %v494_v59, %v486_v58 }
 0xcc4   :  { %1360 = vtanh.f32 %v1651_v60 }
 0xcca   :  { %v1361_v61 = vpop.eup %1360 }
 0xccb   :  { %499 = vrot.lane.b32.xlu1 %v1361_v61, %s1444_s23 }
 0xd3d   :  { %v500_v62 = vpop.permute.xlu1 %499 }
 0xd3e   :  { %v502_v63 = vmul.f32 %v500_v62, %v483_v56 }
 0xd40   :  { %504 = vrot.lane.b32.xlu2 %v502_v63, %s1445_s24 }
 0xd9a   :  { %v505_v10 = vpop.permute.xlu2 %504 }
 0xd9b   :  { %507 = vst.msk [vmem:[#allocation2 + $0x28] sm:$0xff] %vm116_vm5, %v505_v10  ;;  %1280 = vmatmul.msk.f32.vlgmr.msra.gmra.mxu1 %vm116_vm5, %v505_v10 }
 0xd9c   :  { %861 = vmatpush.msra.mxu1 %v1659_v1 }
 0xd9e   :  { %862 = vmatpush.msra.mxu1 %v1664_v3 }
 0xda0   :  { %863 = vmatpush.msra.mxu1 %v1671_v4 }
 0xda2   :  { %v643_v11 = vld [vmem:[#allocation2 + $0x28] sm:$0xff]  ;;  %864 = vmatpush.msra.mxu1 %v1678_v9 }
 0xda3   :  { %1289 = vmatmul.msk.f32.gmra.mxu3 %vm116_vm5, %v643_v11  ;;  %739 = vmatmul.f32.vlgmr.msrb.gmra.mxu1 %v1443_v7  ;;  %v699_v7 = vpop.f32.mrf.mxu3 }
 0xda4   :  { %987 = vmatpush.msrb.mxu1 %v1659_v1  ;;  %v700_v16 = vadd.f32 %v1701_v15, %v699_v7 }
 0xda6   :  { %988 = vmatpush.msrb.mxu1 %v1664_v3 }
 0xda8   :  { %989 = vmatpush.msrb.mxu1 %v1671_v4 }
 0xdaa   :  { %990 = vmatpush.msrb.mxu1 %v1678_v9 }
 0xdab   :  { %v702_v63 = vpop.f32.mrf.mxu3 }
 0xdac   :  { %v703_v10 = vadd.f32 %v1701_v15, %v702_v63 }
 0xe18   :  { %v527_v13 = vpop.f32.mrf.mxu1 }
 0xe19   :  { %v530_v14 = vadd.f32 %v527_v13, %v111_v12 }
 0xe1b   :  { %1362 = vtanh.f32 %v530_v14  ;;  %v1281_v8 = vmul.f32 -1.442695, %v530_v14 }
 0xe20   :  { %v740_v17 = vpop.f32.mrf.mxu1 }
 0xe21   :  { %v1363_v18 = vpop.eup %1362  ;;  %v743_v0 = vadd.f32 %v740_v17, %v700_v16 }
 0xe22   :  { %553 = vrot.lane.b32.xlu0 %v1363_v18, %s1444_s23 }
 0xe23   :  { %1364 = vtanh.f32 %v743_v0  ;;  %v1292_v5 = vmul.f32 -1.442695, %v743_v0 }
 0xe24   :  { %1366 = vpow2.f32 %v1281_v8 }
 0xe25   :  { %1368 = vpow2.f32 %v1292_v5 }
 0xe29   :  { %v1365_v2 = vpop.eup %1364 }
 0xe2a   :  { %766 = vrot.lane.b32.xlu1 %v1365_v2, %s1444_s23  ;;  %v1367_v19 = vpop.eup %1366 }
 0xe2b   :  { %v534_v20 = vadd.f32 1.0, %v1367_v19  ;;  %v1369_v6 = vpop.eup %1368 }
 0xe2c   :  { %v747_v21 = vadd.f32 1.0, %v1369_v6 }
 0xe2d   :  { %1370 = vrcp.f32 %v534_v20  ;;  %v546_v30 = vand.u32 2147483648, %v534_v20  ;;  %vm540_vm12 = vweird.f32 %v534_v20  ;;  %v544_v31 = vand.u32 2147483647, %v534_v20 }
 0xe2e   :  { %1372 = vrcp.f32 %v747_v21  ;;  %v759_v40 = vand.u32 2147483648, %v747_v21  ;;  %vm753_vm1 = vweird.f32 %v747_v21  ;;  %v757_v41 = vand.u32 2147483647, %v747_v21 }
 0xe2f   :  { %v547_v34 = vor.u32 1.1754944e-38, %v546_v30  ;;  %vm545_vm14 = vcmp.eq.f32.partialorder %v544_v31, 8.507059e+37  ;;  %v705_v31 = vpop.f32.mrf.mxu3 }
 0xe30   :  { %v760_v43 = vor.u32 1.1754944e-38, %v759_v40  ;;  %vm758_vm3 = vcmp.eq.f32.partialorder %v757_v41, 8.507059e+37 }
 0xe33   :  { %v1371_v22 = vpop.eup %1370 }
 0xe34   :  { %v536_v23 = vmul.f32 %v1371_v22, %v534_v20  ;;  %v1373_v25 = vpop.eup %1372  ;;  %vm541_vm11 = vweird.f32 %v1371_v22 }
 0xe35   :  { %v749_v27 = vmul.f32 %v1373_v25, %v747_v21  ;;  %vm542_vm13 = vmor %vm540_vm12, %vm541_vm11  ;;  %vm754_vm15 = vweird.f32 %v1373_v25 }
 0xe36   :  { %v537_v24 = vsub.f32 1.0, %v536_v23  ;;  %vm755_vm2 = vmor %vm753_vm1, %vm754_vm15 }
 0xe37   :  { %v750_v29 = vsub.f32 1.0, %v749_v27 }
 0xe38   :  { %v538_v26 = vmul.f32 %v1371_v22, %v537_v24 }
 0xe39   :  { %v751_v33 = vmul.f32 %v1373_v25, %v750_v29 }
 0xe3a   :  { %v539_v28 = vadd.f32 %v1371_v22, %v538_v26 }
 0xe3b   :  { %v752_v39 = vadd.f32 %v1373_v25, %v751_v33 }
 0xe3c   :  { %v543_v32 = vsel %vm542_vm13, %v1371_v22, %v539_v28 }
 0xe3d   :  { %v548_v36 = vsel %vm545_vm14, %v547_v34, %v543_v32  ;;  %v756_v42 = vsel %vm755_vm2, %v1373_v25, %v752_v39  ;;  %v706_v32 = vadd.f32 %v1701_v15, %v705_v31 }
 0xe3e   :  { %v761_v45 = vsel %vm758_vm3, %v760_v43, %v756_v42  ;;  %v551_v47 = vmul.f32 %v548_v36, %v1651_v60 }
 0xe3f   :  { %v764_v51 = vmul.f32 0.0, %v761_v45 }
 0xe94   :  { %v554_v35 = vpop.permute.xlu0 %553 }
 0xe95   :  { %v556_v37 = vmul.f32 %v554_v35, %v548_v36 }
 0xe97   :  { %558 = vrot.lane.b32.xlu2 %v556_v37, %s1445_s24 }
 0xe9c   :  { %v767_v44 = vpop.permute.xlu1 %766 }
 0xe9d   :  { %v769_v46 = vmul.f32 %v767_v44, %v761_v45 }
 0xe9f   :  { %771 = vrot.lane.b32.xlu0 %v769_v46, %s1445_s24 }
 0xef1   :  { %v559_v48 = vpop.permute.xlu2 %558 }
 0xef2   :  { %v1709_v49 = vadd.f32 %v559_v48, %v551_v47 }
 0xef4   :  { %1374 = vtanh.f32 %v1709_v49 }
 0xefa   :  { %v1375_v50 = vpop.eup %1374 }
 0xefb   :  { %564 = vrot.lane.b32.xlu1 %v1375_v50, %s1444_s23 }
 0xf11   :  { %v772_v52 = vpop.permute.xlu0 %771 }
 0xf12   :  { %v774_v53 = vadd.f32 %v772_v52, %v764_v51 }
 0xf14   :  { %1376 = vtanh.f32 %v774_v53 }
 0xf1a   :  { %v1377_v54 = vpop.eup %1376 }
 0xf1b   :  { %777 = vrot.lane.b32.xlu2 %v1377_v54, %s1444_s23 }
 0xf6d   :  { %v565_v55 = vpop.permute.xlu1 %564 }
 0xf6e   :  { %v567_v56 = vmul.f32 %v565_v55, %v548_v36 }
 0xf70   :  { %569 = vrot.lane.b32.xlu0 %v567_v56, %s1445_s24 }
 0xf75   :  { %v778_v57 = vpop.permute.xlu2 %777 }
 0xf76   :  { %v780_v58 = vmul.f32 %v778_v57, %v761_v45 }
 0xf78   :  { %782 = vrot.lane.b32.xlu1 %v780_v58, %s1445_s24 }
 0xfe2   :  { %v570_v59 = vpop.permute.xlu0 %569 }
 0xfe3   :  { %572 = vst.msk [vmem:[#allocation2 + $0x30] sm:$0xff] %vm116_vm5, %v570_v59  ;;  %1282 = vmatmul.msk.f32.vlgmr.msrb.gmra.mxu2 %vm116_vm5, %v570_v59 }
 0xfe4   :  { %924 = vmatpush.msrb.mxu2 %v1659_v1 }
 0xfe6   :  { %925 = vmatpush.msrb.mxu2 %v1664_v3 }
 0xfe8   :  { %926 = vmatpush.msrb.mxu2 %v1671_v4 }
 0xfea   :  { %v783_v60 = vpop.permute.xlu1 %782  ;;  %v644_v61 = vld [vmem:[#allocation2 + $0x30] sm:$0xff]  ;;  %927 = vmatpush.msrb.mxu2 %v1678_v9 }
 0xfeb   :  { %1290 = vmatmul.msk.f32.gmra.mxu3 %vm116_vm5, %v644_v61  ;;  %1293 = vmatmul.msk.f32.vlgmr.msra.gmra.mxu2 %vm116_vm5, %v783_v60  ;;  %v708_v60 = vpop.f32.mrf.mxu3 }
 0xfec   :  { %1050 = vmatpush.msra.mxu2 %v1659_v1  ;;  %v709_v61 = vadd.f32 %v1701_v15, %v708_v60 }
 0xfee   :  { %1051 = vmatpush.msra.mxu2 %v1664_v3 }
 0xff0   :  { %1052 = vmatpush.msra.mxu2 %v1671_v4 }
 0xff2   :  { %1053 = vmatpush.msra.mxu2 %v1678_v9 }
0x1066   :  { %v1728_v62 = vpop.f32.mrf.mxu2 }
0x106e   :  { %v803_v11 = vpop.f32.mrf.mxu2 }
0x106f   :  { %v806_v12 = vadd.f32 %v803_v11, %v703_v10 }
0x1071   :  { %1378 = vtanh.f32 %v806_v12  ;;  %v1294_v14 = vmul.f32 -1.442695, %v806_v12 }
0x1073   :  { %1380 = vpow2.f32 %v1294_v14 }
0x1077   :  { %v1379_v13 = vpop.eup %1378 }
0x1078   :  { %829 = vrot.lane.b32.xlu2 %v1379_v13, %s1444_s23 }
0x1079   :  { %v1381_v7 = vpop.eup %1380 }
0x107a   :  { %v810_v16 = vadd.f32 1.0, %v1381_v7 }
0x107c   :  { %1382 = vrcp.f32 %v810_v16  ;;  %v822_v5 = vand.u32 2147483648, %v810_v16  ;;  %vm816_vm6 = vweird.f32 %v810_v16  ;;  %v820_v19 = vand.u32 2147483647, %v810_v16 }
0x107e   :  { %v823_v6 = vor.u32 1.1754944e-38, %v822_v5  ;;  %vm821_vm0 = vcmp.eq.f32.partialorder %v820_v19, 8.507059e+37 }
0x1082   :  { %v1383_v17 = vpop.eup %1382 }
0x1083   :  { %v812_v18 = vmul.f32 %v1383_v17, %v810_v16  ;;  %vm817_vm4 = vweird.f32 %v1383_v17 }
0x1084   :  { %vm818_vm7 = vmor %vm816_vm6, %vm817_vm4 }
0x1085   :  { %v813_v0 = vsub.f32 1.0, %v812_v18 }
0x1087   :  { %v814_v2 = vmul.f32 %v1383_v17, %v813_v0 }
0x1089   :  { %v815_v8 = vadd.f32 %v1383_v17, %v814_v2 }
0x108b   :  { %v819_v20 = vsel %vm818_vm7, %v1383_v17, %v815_v8 }
0x108c   :  { %v824_v22 = vsel %vm821_vm0, %v823_v6, %v819_v20 }
0x108d   :  { %v827_v24 = vmul.f32 %v824_v22, %v774_v53 }
0x10d2   :  { %v830_v21 = vpop.permute.xlu2 %829 }
0x10d3   :  { %v832_v23 = vmul.f32 %v830_v21, %v824_v22 }
0x10d5   :  { %834 = vrot.lane.b32.xlu0 %v832_v23, %s1445_s24 }
0x1147   :  { %v835_v25 = vpop.permute.xlu0 %834 }
0x1148   :  { %v837_v26 = vadd.f32 %v835_v25, %v827_v24  ;;  %v711_v25 = vpop.f32.mrf.mxu3 }
0x114a   :  { %1384 = vtanh.f32 %v837_v26 }
0x1150   :  { %v1385_v27 = vpop.eup %1384 }
0x1151   :  { %840 = vrot.lane.b32.xlu1 %v1385_v27, %s1444_s23 }
0x11c3   :  { %v841_v28 = vpop.permute.xlu1 %840 }
0x11c4   :  { %v843_v29 = vmul.f32 %v841_v28, %v824_v22 }
0x11c6   :  { %845 = vrot.lane.b32.xlu2 %v843_v29, %s1445_s24 }
0x1220   :  { %v846_v30 = vpop.permute.xlu2 %845 }
0x1221   :  { %1295 = vmatmul.msk.f32.vlgmr.msra.gmra.mxu1 %vm116_vm5, %v846_v30 }
0x1222   :  { %1113 = vmatpush.msra.mxu1 %v1659_v1 }
0x1224   :  { %1114 = vmatpush.msra.mxu1 %v1664_v3 }
0x1226   :  { %1115 = vmatpush.msra.mxu1 %v1671_v4 }
0x1228   :  { %1116 = vmatpush.msra.mxu1 %v1678_v9 }
0x129e   :  { %v866_v33 = vpop.f32.mrf.mxu1 }
0x129f   :  { %v869_v34 = vadd.f32 %v866_v33, %v706_v32 }
0x12a1   :  { %1386 = vtanh.f32 %v869_v34  ;;  %v1296_v36 = vmul.f32 -1.442695, %v869_v34 }
0x12a3   :  { %1388 = vpow2.f32 %v1296_v36 }
0x12a7   :  { %v1387_v35 = vpop.eup %1386 }
0x12a8   :  { %892 = vrot.lane.b32.xlu0 %v1387_v35, %s1444_s23 }
0x12a9   :  { %v1389_v37 = vpop.eup %1388 }
0x12aa   :  { %v873_v39 = vadd.f32 1.0, %v1389_v37 }
0x12ac   :  { %1390 = vrcp.f32 %v873_v39  ;;  %v885_v45 = vand.u32 2147483648, %v873_v39  ;;  %vm879_vm9 = vweird.f32 %v873_v39  ;;  %v883_v46 = vand.u32 2147483647, %v873_v39 }
0x12ae   :  { %v886_v48 = vor.u32 1.1754944e-38, %v885_v45  ;;  %vm884_vm11 = vcmp.eq.f32.partialorder %v883_v46, 8.507059e+37 }
0x12b2   :  { %v1391_v40 = vpop.eup %1390 }
0x12b3   :  { %v875_v41 = vmul.f32 %v1391_v40, %v873_v39  ;;  %vm880_vm8 = vweird.f32 %v1391_v40 }
0x12b4   :  { %vm881_vm10 = vmor %vm879_vm9, %vm880_vm8 }
0x12b5   :  { %v876_v42 = vsub.f32 1.0, %v875_v41 }
0x12b7   :  { %v877_v43 = vmul.f32 %v1391_v40, %v876_v42 }
0x12b9   :  { %v878_v44 = vadd.f32 %v1391_v40, %v877_v43 }
0x12bb   :  { %v882_v47 = vsel %vm881_vm10, %v1391_v40, %v878_v44 }
0x12bc   :  { %v887_v51 = vsel %vm884_vm11, %v886_v48, %v882_v47 }
0x12bd   :  { %v890_v53 = vmul.f32 %v887_v51, %v837_v26  ;;  %v712_v26 = vadd.f32 %v1701_v15, %v711_v25 }
0x131a   :  { %v893_v50 = vpop.permute.xlu0 %892 }
0x131b   :  { %v895_v52 = vmul.f32 %v893_v50, %v887_v51 }
0x131d   :  { %897 = vrot.lane.b32.xlu1 %v895_v52, %s1445_s24 }
0x138f   :  { %v898_v54 = vpop.permute.xlu1 %897 }
0x1390   :  { %v900_v55 = vadd.f32 %v898_v54, %v890_v53  ;;  %v714_v54 = vpop.f32.mrf.mxu3 }
0x1392   :  { %1392 = vtanh.f32 %v900_v55 }
0x1398   :  { %v1393_v56 = vpop.eup %1392 }
0x1399   :  { %903 = vrot.lane.b32.xlu2 %v1393_v56, %s1444_s23 }
0x13f3   :  { %v904_v57 = vpop.permute.xlu2 %903 }
0x13f4   :  { %v906_v58 = vmul.f32 %v904_v57, %v887_v51 }
0x13f6   :  { %908 = vrot.lane.b32.xlu0 %v906_v58, %s1445_s24 }
0x1468   :  { %v909_v59 = vpop.permute.xlu0 %908 }
0x1469   :  { %1297 = vmatmul.msk.f32.vlgmr.msrb.gmra.mxu2 %vm116_vm5, %v909_v59 }
0x146a   :  { %1176 = vmatpush.msrb.mxu2 %v1659_v1 }
0x146c   :  { %1177 = vmatpush.msrb.mxu2 %v1664_v3 }
0x146e   :  { %1178 = vmatpush.msrb.mxu2 %v1671_v4 }
0x1470   :  { %1179 = vmatpush.msrb.mxu2 %v1678_v9 }
0x14ec   :  { %v929_v63 = vpop.f32.mrf.mxu2 }
0x14ed   :  { %v932_v10 = vadd.f32 %v929_v63, %v709_v61 }
0x14ef   :  { %1394 = vtanh.f32 %v932_v10  ;;  %v1298_v12 = vmul.f32 -1.442695, %v932_v10 }
0x14f1   :  { %1396 = vpow2.f32 %v1298_v12 }
0x14f5   :  { %v1395_v11 = vpop.eup %1394 }
0x14f6   :  { %955 = vrot.lane.b32.xlu1 %v1395_v11, %s1444_s23 }
0x14f7   :  { %v1397_v13 = vpop.eup %1396 }
0x14f8   :  { %v936_v14 = vadd.f32 1.0, %v1397_v13 }
0x14fa   :  { %1398 = vrcp.f32 %v936_v14  ;;  %v948_v9 = vand.u32 2147483648, %v936_v14  ;;  %vm942_vm13 = vweird.f32 %v936_v14  ;;  %v946_v17 = vand.u32 2147483647, %v936_v14 }
0x14fc   :  { %v949_v0 = vor.u32 1.1754944e-38, %v948_v9  ;;  %vm947_vm15 = vcmp.eq.f32.partialorder %v946_v17, 8.507059e+37 }
0x1500   :  { %v1399_v1 = vpop.eup %1398 }
0x1501   :  { %v938_v3 = vmul.f32 %v1399_v1, %v936_v14  ;;  %vm943_vm12 = vweird.f32 %v1399_v1 }
0x1502   :  { %vm944_vm14 = vmor %vm942_vm13, %vm943_vm12 }
0x1503   :  { %v939_v7 = vsub.f32 1.0, %v938_v3 }
0x1505   :  { %v940_v4 = vmul.f32 %v1399_v1, %v939_v7  ;;  %v1442_v7 = vld [vmem:[%s1817_s3] ss:$0 sm:$0xff] }
0x1507   :  { %v941_v16 = vadd.f32 %v1399_v1, %v940_v4  ;;  %v114_v4 = vadd.f32 %v1442_v7, %v1646_v38 }
0x1509   :  { %v945_v18 = vsel %vm944_vm14, %v1399_v1, %v941_v16  ;;  %v595_v9 = vadd.f32 %v1728_v62, %v114_v4 }
0x150a   :  { %v950_v8 = vsel %vm947_vm15, %v949_v0, %v945_v18 }
0x150b   :  { %v953_v19 = vmul.f32 %v950_v8, %v900_v55  ;;  %v715_v55 = vadd.f32 %v1701_v15, %v714_v54 }
0x1568   :  { %v956_v2 = vpop.permute.xlu1 %955 }
0x1569   :  { %v958_v5 = vmul.f32 %v956_v2, %v950_v8 }
0x156b   :  { %960 = vrot.lane.b32.xlu2 %v958_v5, %s1445_s24 }
0x15c5   :  { %v961_v20 = vpop.permute.xlu2 %960 }
0x15c6   :  { %v963_v6 = vadd.f32 %v961_v20, %v953_v19  ;;  %v1283_v20 = vmul.f32 -1.442695, %v595_v9 }
0x15c8   :  { %1400 = vtanh.f32 %v963_v6 }
0x15ce   :  { %v1401_v21 = vpop.eup %1400 }
0x15cf   :  { %966 = vrot.lane.b32.xlu0 %v1401_v21, %s1444_s23 }
0x1641   :  { %v967_v22 = vpop.permute.xlu0 %966 }
0x1642   :  { %v969_v23 = vmul.f32 %v967_v22, %v950_v8 }
0x1644   :  { %971 = vrot.lane.b32.xlu1 %v969_v23, %s1445_s24 }
0x16b6   :  { %v972_v24 = vpop.permute.xlu1 %971 }
0x16b7   :  { %1299 = vmatmul.msk.f32.vlgmr.msrb.gmra.mxu1 %vm116_vm5, %v972_v24 }
0x1734   :  { %v992_v27 = vpop.f32.mrf.mxu1 }
0x1735   :  { %v995_v28 = vadd.f32 %v992_v27, %v712_v26 }
0x1737   :  { %1402 = vtanh.f32 %v995_v28  ;;  %v1300_v30 = vmul.f32 -1.442695, %v995_v28 }
0x1739   :  { %1404 = vpow2.f32 %v1300_v30 }
0x173d   :  { %v1403_v29 = vpop.eup %1402 }
0x173e   :  { %1018 = vrot.lane.b32.xlu2 %v1403_v29, %s1444_s23 }
0x173f   :  { %v1405_v31 = vpop.eup %1404 }
0x1740   :  { %v999_v32 = vadd.f32 1.0, %v1405_v31 }
0x1742   :  { %1406 = vrcp.f32 %v999_v32  ;;  %v1011_v39 = vand.u32 2147483648, %v999_v32  ;;  %vm1005_vm2 = vweird.f32 %v999_v32  ;;  %v1009_v40 = vand.u32 2147483647, %v999_v32 }
0x1744   :  { %v1012_v42 = vor.u32 1.1754944e-38, %v1011_v39  ;;  %vm1010_vm4 = vcmp.eq.f32.partialorder %v1009_v40, 8.507059e+37 }
0x1748   :  { %v1407_v33 = vpop.eup %1406 }
0x1749   :  { %v1001_v34 = vmul.f32 %v1407_v33, %v999_v32  ;;  %vm1006_vm1 = vweird.f32 %v1407_v33 }
0x174a   :  { %vm1007_vm3 = vmor %vm1005_vm2, %vm1006_vm1 }
0x174b   :  { %v1002_v35 = vsub.f32 1.0, %v1001_v34 }
0x174d   :  { %v1003_v36 = vmul.f32 %v1407_v33, %v1002_v35 }
0x174f   :  { %v1004_v37 = vadd.f32 %v1407_v33, %v1003_v36  ;;  %v717_v36 = vpop.f32.mrf.mxu3 }
0x1751   :  { %v1008_v41 = vsel %vm1007_vm3, %v1407_v33, %v1004_v37  ;;  %v718_v37 = vadd.f32 %v1701_v15, %v717_v36 }
0x1752   :  { %v1013_v44 = vsel %vm1010_vm4, %v1012_v42, %v1008_v41 }
0x1753   :  { %v1016_v46 = vmul.f32 %v1013_v44, %v963_v6 }
0x1798   :  { %v1019_v43 = vpop.permute.xlu2 %1018 }
0x1799   :  { %v1021_v45 = vmul.f32 %v1019_v43, %v1013_v44 }
0x179b   :  { %1023 = vrot.lane.b32.xlu0 %v1021_v45, %s1445_s24 }
0x180d   :  { %v1024_v47 = vpop.permute.xlu0 %1023 }
0x180e   :  { %v1026_v48 = vadd.f32 %v1024_v47, %v1016_v46 }
0x1810   :  { %1408 = vtanh.f32 %v1026_v48 }
0x1816   :  { %v1409_v50 = vpop.eup %1408 }
0x1817   :  { %1029 = vrot.lane.b32.xlu1 %v1409_v50, %s1444_s23 }
0x1889   :  { %v1030_v51 = vpop.permute.xlu1 %1029 }
0x188a   :  { %v1032_v52 = vmul.f32 %v1030_v51, %v1013_v44 }
0x188c   :  { %1034 = vrot.lane.b32.xlu2 %v1032_v52, %s1445_s24 }
0x18e6   :  { %v1035_v53 = vpop.permute.xlu2 %1034 }
0x18e7   :  { %1301 = vmatmul.msk.f32.vlgmr.msra.gmra.mxu2 %vm116_vm5, %v1035_v53 }
0x196a   :  { %v1055_v56 = vpop.f32.mrf.mxu2 }
0x196b   :  { %v1058_v57 = vadd.f32 %v1055_v56, %v715_v55 }
0x196d   :  { %1410 = vtanh.f32 %v1058_v57  ;;  %v1302_v59 = vmul.f32 -1.442695, %v1058_v57 }
0x196f   :  { %1412 = vpow2.f32 %v1302_v59 }
0x1973   :  { %v1411_v58 = vpop.eup %1410 }
0x1974   :  { %1081 = vrot.lane.b32.xlu0 %v1411_v58, %s1444_s23 }
0x1975   :  { %v1413_v60 = vpop.eup %1412 }
0x1976   :  { %v1062_v61 = vadd.f32 1.0, %v1413_v60 }
0x1978   :  { %1414 = vrcp.f32 %v1062_v61  ;;  %v1074_v14 = vand.u32 2147483648, %v1062_v61  ;;  %vm1068_vm7 = vweird.f32 %v1062_v61  ;;  %v1072_v1 = vand.u32 2147483647, %v1062_v61 }
0x1979   :  { %1416 = vtanh.f32 %v595_v9 }
0x197a   :  { %v1075_v16 = vor.u32 1.1754944e-38, %v1074_v14  ;;  %vm1073_vm8 = vcmp.eq.f32.partialorder %v1072_v1, 8.507059e+37 }
0x197e   :  { %v1415_v63 = vpop.eup %1414 }
0x197f   :  { %v1064_v10 = vmul.f32 %v1415_v63, %v1062_v61  ;;  %vm1069_vm6 = vweird.f32 %v1415_v63  ;;  %v1417_v2 = vpop.eup %1416 }
0x1980   :  { %vm1070_vm0 = vmor %vm1068_vm7, %vm1069_vm6  ;;  %vm1255_vm7 = vcmask 15360  }
0x1981   :  { %v1065_v11 = vsub.f32 1.0, %v1064_v10 }
0x1983   :  { %v1066_v12 = vmul.f32 %v1415_v63, %v1065_v11 }
0x1985   :  { %v1067_v13 = vadd.f32 %v1415_v63, %v1066_v12 }
0x1987   :  { %v1071_v3 = vsel %vm1070_vm0, %v1415_v63, %v1067_v13 }
0x1988   :  { %v1076_v18 = vsel %vm1073_vm8, %v1075_v16, %v1071_v3 }
0x1989   :  { %v1079_v8 = vmul.f32 %v1076_v18, %v1026_v48 }
0x19e6   :  { %v1082_v17 = vpop.permute.xlu0 %1081 }
0x19e7   :  { %v1084_v0 = vmul.f32 %v1082_v17, %v1076_v18 }
0x19e9   :  { %1086 = vrot.lane.b32.xlu1 %v1084_v0, %s1445_s24 }
0x19f1   :  { %618 = vrot.lane.b32.xlu1 %v1417_v2, %s1444_s23 }
0x1a5b   :  { %v1087_v5 = vpop.permute.xlu1 %1086 }
0x1a5c   :  { %v1771_v19 = vadd.f32 %v1087_v5, %v1079_v8 }
0x1a5e   :  { %1418 = vtanh.f32 %v1771_v19 }
0x1a5f   :  { %1420 = vpow2.f32 %v1283_v20 }
0x1a63   :  { %v619_v32 = vpop.permute.xlu1 %618 }
0x1a64   :  { %v1419_v38 = vpop.eup %1418 }
0x1a65   :  { %1092 = vrot.lane.b32.xlu2 %v1419_v38, %s1444_s23  ;;  %v1421_v62 = vpop.eup %1420 }
0x1a66   :  { %v599_v6 = vadd.f32 1.0, %v1421_v62 }
0x1a68   :  { %1422 = vrcp.f32 %v599_v6  ;;  %v611_v28 = vand.u32 2147483648, %v599_v6  ;;  %vm605_vm10 = vweird.f32 %v599_v6  ;;  %v609_v29 = vand.u32 2147483647, %v599_v6 }
0x1a6a   :  { %v612_v31 = vor.u32 1.1754944e-38, %v611_v28  ;;  %vm610_vm12 = vcmp.eq.f32.partialorder %v609_v29, 8.507059e+37 }
0x1a6e   :  { %v1423_v21 = vpop.eup %1422 }
0x1a6f   :  { %v601_v22 = vmul.f32 %v1423_v21, %v599_v6  ;;  %vm606_vm9 = vweird.f32 %v1423_v21 }
0x1a70   :  { %vm607_vm11 = vmor %vm605_vm10, %vm606_vm9 }
0x1a71   :  { %v602_v23 = vsub.f32 1.0, %v601_v22 }
0x1a73   :  { %v603_v24 = vmul.f32 %v1423_v21, %v602_v23 }
0x1a75   :  { %v604_v26 = vadd.f32 %v1423_v21, %v603_v24 }
0x1a77   :  { %v608_v30 = vsel %vm607_vm11, %v1423_v21, %v604_v26 }
0x1a78   :  { %v613_v33 = vsel %vm610_vm12, %v612_v31, %v608_v30  ;;  %v1225_v31 = vld [vmem:[%s1821_s7 + $0x18] sm:$0xff] }
0x1a79   :  { %v621_v34 = vmul.f32 %v619_v32, %v613_v33  ;;  %v616_v42 = vmul.f32 %v613_v33, %v1709_v49  ;;  %v1224_v32 = vld [vmem:[%s1821_s7 + $0x10] sm:$0xff]  ;;  %1247 = vmatpush.msrb.mxu1 %v1225_v31 }
0x1a7b   :  { %1248 = vmatpush.msrb.mxu1 %v1224_v32 }
0x1abf   :  { %v1093_v25 = vpop.permute.xlu2 %1092 }
0x1ac0   :  { %v1095_v27 = vmul.f32 %v1093_v25, %v1076_v18 }
0x1ac2   :  { %1097 = vrot.lane.b32.xlu0 %v1095_v27, %s1445_s24 }
0x1aca   :  { %623 = vrot.lane.b32.xlu0 %v621_v34, %s1445_s24  ;;  %v1222_v34 = vld [vmem:[%s1821_s7] sm:$0xff] }
0x1b34   :  { %v1098_v35 = vpop.permute.xlu0 %1097 }
0x1b35   :  { %1303 = vmatmul.msk.f32.vlgmr.msra.gmra.mxu1 %vm116_vm5, %v1098_v35 }
0x1b3c   :  { %v624_v41 = vpop.permute.xlu0 %623 }
0x1b3d   :  { %v626_v43 = vadd.f32 %v624_v41, %v616_v42 }
0x1bb2   :  { %v1118_v39 = vpop.f32.mrf.mxu1 }
0x1bb3   :  { %v1121_v40 = vadd.f32 %v1118_v39, %v718_v37  ;;  %v1313_v39 = vld [vmem:[%s1822_s8] ss:$0 sm:$0xff] }
0x1bb5   :  { %1424 = vtanh.f32 %v1121_v40  ;;  %v1304_v46 = vmul.f32 -1.442695, %v1121_v40 }
0x1bb6   :  { %1426 = vtanh.f32 %v626_v43 }
0x1bb7   :  { %1428 = vpow2.f32 %v1304_v46 }
0x1bbb   :  { %v1425_v44 = vpop.eup %1424 }
0x1bbc   :  { %1144 = vrot.lane.b32.xlu2 %v1425_v44, %s1444_s23  ;;  %v1427_v45 = vpop.eup %1426 }
0x1bbd   :  { %v1429_v47 = vpop.eup %1428 }
0x1bbe   :  { %v1125_v48 = vadd.f32 1.0, %v1429_v47 }
0x1bc0   :  { %1430 = vrcp.f32 %v1125_v48  ;;  %v1137_v49 = vand.u32 2147483648, %v1125_v48  ;;  %vm1131_vm14 = vweird.f32 %v1125_v48  ;;  %v1135_v55 = vand.u32 2147483647, %v1125_v48 }
0x1bc2   :  { %v1138_v57 = vor.u32 1.1754944e-38, %v1137_v49  ;;  %vm1136_vm1 = vcmp.eq.f32.partialorder %v1135_v55, 8.507059e+37 }
0x1bc4   :  { %629 = vrot.lane.b32.xlu2 %v1427_v45, %s1444_s23 }
0x1bc6   :  { %v1431_v50 = vpop.eup %1430 }
0x1bc7   :  { %v1127_v51 = vmul.f32 %v1431_v50, %v1125_v48  ;;  %vm1132_vm13 = vweird.f32 %v1431_v50 }
0x1bc8   :  { %vm1133_vm15 = vmor %vm1131_vm14, %vm1132_vm13 }
0x1bc9   :  { %v1128_v52 = vsub.f32 1.0, %v1127_v51 }
0x1bcb   :  { %v1129_v53 = vmul.f32 %v1431_v50, %v1128_v52 }
0x1bcd   :  { %v1130_v54 = vadd.f32 %v1431_v50, %v1129_v53 }
0x1bcf   :  { %v1134_v56 = vsel %vm1133_vm15, %v1431_v50, %v1130_v54 }
0x1bd0   :  { %v1139_v59 = vsel %vm1136_vm1, %v1138_v57, %v1134_v56 }
0x1bd1   :  { %v1142_v10 = vmul.f32 %v1139_v59, %v1771_v19 }
0x1c16   :  { %v1145_v58 = vpop.permute.xlu2 %1144 }
0x1c17   :  { %v1147_v60 = vmul.f32 %v1145_v58, %v1139_v59 }
0x1c19   :  { %1149 = vrot.lane.b32.xlu1 %v1147_v60, %s1445_s24 }
0x1c1e   :  { %v630_v61 = vpop.permute.xlu2 %629 }
0x1c1f   :  { %v632_v63 = vmul.f32 %v630_v61, %v613_v33  ;;  %v1223_v33 = vld [vmem:[%s1821_s7 + $0x8] sm:$0xff] }
0x1c20   :  { %1249 = vmatpush.msrb.mxu1 %v1223_v33 }
0x1c21   :  { %634 = vrot.lane.b32.xlu1 %v632_v63, %s1445_s24 }
0x1c22   :  { %1250 = vmatpush.msrb.mxu1 %v1222_v34 }
0x1c8b   :  { %v1150_v11 = vpop.permute.xlu1 %1149 }
0x1c8c   :  { %v1152_v12 = vadd.f32 %v1150_v11, %v1142_v10 }
0x1c8e   :  { %1432 = vtanh.f32 %v1152_v12 }
0x1c93   :  { %v635_v13 = vpop.permute.xlu1 %634 }
0x1c94   :  { %v1433_v14 = vpop.eup %1432  ;;  %637 = vst.msk [vmem:[#allocation2 + $0x38] sm:$0xff] %vm116_vm5, %v635_v13 }
0x1c95   :  { %1155 = vrot.lane.b32.xlu0 %v1433_v14, %s1444_s23 }
0x1c9b   :  { %v645_v1 = vld [vmem:[#allocation2 + $0x38] sm:$0xff] }
0x1c9c   :  { %1291 = vmatmul.msk.f32.gmra.mxu3 %vm116_vm5, %v645_v1 }
0x1d07   :  { %v1156_v3 = vpop.permute.xlu0 %1155 }
0x1d08   :  { %v1158_v7 = vmul.f32 %v1156_v3, %v1139_v59 }
0x1d0a   :  { %1160 = vrot.lane.b32.xlu2 %v1158_v7, %s1445_s24 }
0x1d1f   :  { %v720_v16 = vpop.f32.mrf.mxu3 }
0x1d20   :  { %v721_v9 = vadd.f32 %v1701_v15, %v720_v16 }
0x1d64   :  { %v1161_v4 = vpop.permute.xlu2 %1160 }
0x1d65   :  { %1305 = vmatmul.msk.f32.vlgmr.msrb.gmra.mxu2 %vm116_vm5, %v1161_v4 }
0x1de8   :  { %v1181_v17 = vpop.f32.mrf.mxu2 }
0x1de9   :  { %v1184_v18 = vadd.f32 %v1181_v17, %v721_v9 }
0x1deb   :  { %1434 = vtanh.f32 %v1184_v18  ;;  %v1306_v2 = vmul.f32 -1.442695, %v1184_v18 }
0x1ded   :  { %1436 = vpow2.f32 %v1306_v2 }
0x1df1   :  { %v1435_v0 = vpop.eup %1434 }
0x1df2   :  { %1207 = vrot.lane.b32.xlu0 %v1435_v0, %s1444_s23 }
0x1df3   :  { %v1437_v8 = vpop.eup %1436 }
0x1df4   :  { %v1188_v5 = vadd.f32 1.0, %v1437_v8 }
0x1df6   :  { %1438 = vrcp.f32 %v1188_v5  ;;  %v1200_v21 = vand.u32 2147483648, %v1188_v5  ;;  %vm1194_vm3 = vweird.f32 %v1188_v5  ;;  %v1198_v15 = vand.u32 2147483647, %v1188_v5 }
0x1df8   :  { %v1201_v23 = vor.u32 1.1754944e-38, %v1200_v21  ;;  %vm1199_vm6 = vcmp.eq.f32.partialorder %v1198_v15, 8.507059e+37 }
0x1dfc   :  { %v1439_v19 = vpop.eup %1438 }
0x1dfd   :  { %v1190_v38 = vmul.f32 %v1439_v19, %v1188_v5  ;;  %vm1195_vm2 = vweird.f32 %v1439_v19 }
0x1dfe   :  { %vm1196_vm4 = vmor %vm1194_vm3, %vm1195_vm2 }
0x1dff   :  { %v1191_v20 = vsub.f32 1.0, %v1190_v38 }
0x1e01   :  { %v1192_v62 = vmul.f32 %v1439_v19, %v1191_v20 }
0x1e03   :  { %v1193_v6 = vadd.f32 %v1439_v19, %v1192_v62 }
0x1e05   :  { %v1197_v22 = vsel %vm1196_vm4, %v1439_v19, %v1193_v6 }
0x1e06   :  { %v1202_v25 = vsel %vm1199_vm6, %v1201_v23, %v1197_v22 }
0x1e07   :  { %v1205_v27 = vmul.f32 %v1202_v25, %v1152_v12 }
0x1e64   :  { %v1208_v24 = vpop.permute.xlu0 %1207 }
0x1e65   :  { %v1210_v26 = vmul.f32 %v1208_v24, %v1202_v25 }
0x1e67   :  { %1212 = vrot.lane.b32.xlu1 %v1210_v26, %s1445_s24 }
0x1ed9   :  { %v1213_v28 = vpop.permute.xlu1 %1212 }
0x1eda   :  { %v1215_v29 = vadd.f32 %v1213_v28, %v1205_v27 }
0x1edc   :  { %1440 = vtanh.f32 %v1215_v29 }
0x1ee2   :  { %v1441_v30 = vpop.eup %1440 }
0x1ee3   :  { %1218 = vrot.lane.b32.xlu2 %v1441_v30, %s1444_s23 }
0x1f3d   :  { %v1219_v35 = vpop.permute.xlu2 %1218 }
0x1f3e   :  { %v1221_v36 = vmul.f32 %v1219_v35, %v1202_v25 }
0x1f40   :  { %1231 = vrot.lane.b32.xlu0 %v1221_v36, %s1445_s24 }
0x1fb2   :  { %v1232_v37 = vpop.permute.xlu0 %1231 }
0x1fb3   :  { %1307 = vmatmul.msk.f32.vlgmr.msrb.gmra.mxu1 %vm116_vm5, %v1232_v37 }
0x2030   :  { %v1252_v40 = vpop.f32.mrf.mxu1 }
0x2031   :  { %v1253_v41 = vadd.f32 %v1313_v39, %v1252_v40 }
0x2033   :  { %1256 = vst.msk [vmem:[%s1823_s9] sm:$0xff] %vm1255_vm7, %v1253_v41 }

</bundles_post_ra>
